<compile_context>
chip_gen: v5e
topology: v5e:2x2
jax: 0.10.0
libtpu: 0.0.40
codegen_flags: <defaults>
</compile_context>

<pallas_src>
import jax
import jax.numpy as jnp
from jax.experimental import pallas as pl
from jax.experimental.pallas import tpu as pltpu

EMBEDDING_DIM = 128
LSTM_SIZE = 128
NUM_LAYERS = 1


def lstm_encoder_kernel(x_ref, wih_ref, whh_ref, b_ref, h_ref, c_ref, xw_ref):
    """Full LSTM recurrence for one sentence.

    x_ref   : (T, E)  gathered embeddings (VMEM)
    wih_ref : (E, 4H) pre-transposed input weights (VMEM)
    whh_ref : (H, 4H) pre-transposed recurrent weights (VMEM)
    b_ref   : (1, 4H) combined bias b_ih + b_hh (VMEM)
    h_ref/c_ref : (1, H) final state outputs (VMEM)
    xw_ref  : (T, 4H) VMEM scratch holding the precomputed input projection
    """
    T = x_ref.shape[0]
    H = h_ref.shape[-1]

    # Prologue: one well-shaped batched MXU matmul for all tokens, bias folded.
    xw_ref[...] = (
        jnp.dot(x_ref[...], wih_ref[...], preferred_element_type=jnp.float32)
        + b_ref[...]
    )

    # Hoist the recurrent weight load out of the loop (vregs, loaded once).
    whh = whh_ref[...]                                     # (H, 4H)

    h = jnp.zeros((1, H), jnp.float32)                     # init_state(): zeros
    c = jnp.zeros((1, H), jnp.float32)

    # T is small and static -> full unroll with static slice starts.
    for t in range(T):
        gates = xw_ref[pl.ds(t, 1), :] + jnp.dot(
            h, whh, preferred_element_type=jnp.float32
        )                                                  # (1, 4H), order i,f,g,o
        i_g = jax.nn.sigmoid(gates[:, 0 * H:1 * H])
        f_g = jax.nn.sigmoid(gates[:, 1 * H:2 * H])
        g_g = jnp.tanh(gates[:, 2 * H:3 * H])
        o_g = jax.nn.sigmoid(gates[:, 3 * H:4 * H])
        c = f_g * c + i_g * g_g
        h = o_g * jnp.tanh(c)

    h_ref[...] = h
    c_ref[...] = c


def prepare_encoder_params(emb, w_ih, w_hh, b_ih, b_hh):
    """One-time parameter layout: transpose weights, combine biases."""
    H = LSTM_SIZE
    return {
        "emb": emb,                                         # (V, E), stays in HBM
        "wih_t": jnp.asarray(w_ih.T),                       # (E, 4H)
        "whh_t": jnp.asarray(w_hh.T),                       # (H, 4H)
        "b": jnp.asarray((b_ih + b_hh).reshape(1, 4 * H)),  # (1, 4H)
    }


def encoder_forward(ids, mask_array, params):
    """Equivalent of Encoder.forward: returns (state_h, state_c), each (1,1,H).

    `mask_array` only truncates to the common length via zip() in the PyTorch
    code; the per-token mask value is never used.
    """
    T = min(int(ids.shape[0]), len(mask_array))
    ids = ids[:T]
    H = LSTM_SIZE

    # Embedding gather outside the kernel: only T rows ever touch VMEM
    # (vocab table never leaves HBM; jnp.take clamps OOB ids).
    x = jnp.take(params["emb"], ids, axis=0).astype(jnp.float32)   # (T, E)

    vmem = lambda: pl.BlockSpec(memory_space=pltpu.MemorySpace.VMEM)

    h, c = pl.pallas_call(
        lstm_encoder_kernel,
        out_shape=(
            jax.ShapeDtypeStruct((1, H), jnp.float32),
            jax.ShapeDtypeStruct((1, H), jnp.float32),
        ),
        in_specs=[vmem(), vmem(), vmem(), vmem()],
        out_specs=(vmem(), vmem()),
        scratch_shapes=[pltpu.VMEM((T, 4 * H), jnp.float32)],
    )(x, params["wih_t"], params["whh_t"], params["b"])

    # PyTorch LSTM state shape: (num_layers=1, batch=1, hidden)
    return h.reshape(NUM_LAYERS, 1, H), c.reshape(NUM_LAYERS, 1, H)


def encoder_forward_ref(ids, mask_array, emb, w_ih, w_hh, b_ih, b_hh):
    """Pure-JAX reference mirroring torch.nn.LSTM cell math."""
    T = min(ids.shape[0], len(mask_array))
    H = LSTM_SIZE
    h = jnp.zeros((1, H), jnp.float32)
    c = jnp.zeros((1, H), jnp.float32)
    for t in range(T):
        xt = emb[ids[t]][None, :]
        gates = xt @ w_ih.T + h @ w_hh.T + b_ih + b_hh
        i_g = jax.nn.sigmoid(gates[:, 0 * H:1 * H])
        f_g = jax.nn.sigmoid(gates[:, 1 * H:2 * H])
        g_g = jnp.tanh(gates[:, 2 * H:3 * H])
        o_g = jax.nn.sigmoid(gates[:, 3 * H:4 * H])
        c = f_g * c + i_g * g_g
        h = o_g * jnp.tanh(c)
    return h.reshape(NUM_LAYERS, 1, H), c.reshape(NUM_LAYERS, 1, H)


if __name__ == "__main__":
    # --- tiny in-script "tokenizer" (deterministic synthetic vocab) ---
    vocab = ["<unk>", "the", "quick", "brown", "fox", "jumps", "over", "lazy", "dog"]
    word2id = {w: i for i, w in enumerate(vocab)}
    n_vocab = len(vocab)

    sentence = "the quick brown fox jumps over the lazy"
    ids_list = [word2id.get(w, 0) for w in sentence.split()]   # seq len = 8
    mask_array = [0, 1, 0, 0, 1, 0, 0, 1]                      # per-token value unused, as in torch

    # --- deterministic parameter init (matching module __init__ shapes) ---
    key = jax.random.PRNGKey(0)
    k_emb, k_wih, k_whh, k_bih, k_bhh = jax.random.split(key, 5)
    s = 1.0 / jnp.sqrt(LSTM_SIZE)
    emb = jax.random.normal(k_emb, (n_vocab, EMBEDDING_DIM), jnp.float32)
    w_ih = jax.random.uniform(k_wih, (4 * LSTM_SIZE, EMBEDDING_DIM), jnp.float32, -s, s)
    w_hh = jax.random.uniform(k_whh, (4 * LSTM_SIZE, LSTM_SIZE), jnp.float32, -s, s)
    b_ih = jax.random.uniform(k_bih, (4 * LSTM_SIZE,), jnp.float32, -s, s)
    b_hh = jax.random.uniform(k_bhh, (4 * LSTM_SIZE,), jnp.float32, -s, s)

    ids = jnp.asarray(ids_list, dtype=jnp.int32)

    # One-time parameter layout (transposes / bias combine hoisted out of forward).
    params = prepare_encoder_params(emb, w_ih, w_hh, b_ih, b_hh)

    state_h, state_c = encoder_forward(ids, mask_array, params)
    state_h = jax.block_until_ready(state_h)
    state_c = jax.block_until_ready(state_c)

    ref_h, ref_c = encoder_forward_ref(ids, mask_array, emb, w_ih, w_hh, b_ih, b_hh)
    assert state_h.shape == (1, 1, LSTM_SIZE) and state_c.shape == (1, 1, LSTM_SIZE)
    assert jnp.allclose(state_h, ref_h, atol=1e-5), "state_h mismatch vs reference"
    assert jnp.allclose(state_c, ref_c, atol=1e-5), "state_c mismatch vs reference"

    print("KERNEL_OK")
</pallas_src>

<mosaic_0001>
module attributes {stable_mosaic.version = 11 : i64} {
  func.func @lstm_encoder_kernel(%arg0: memref<8x128xf32, #tpu.memory_space<vmem>>, %arg1: memref<128x512xf32, #tpu.memory_space<vmem>>, %arg2: memref<128x512xf32, #tpu.memory_space<vmem>>, %arg3: memref<1x512xf32, #tpu.memory_space<vmem>>, %arg4: memref<1x128xf32, #tpu.memory_space<vmem>>, %arg5: memref<1x128xf32, #tpu.memory_space<vmem>>, %arg6: memref<8x512xf32, #tpu.memory_space<vmem>>) attributes {dimension_semantics = [], scalar_prefetch = 0 : i64, scratch_operands = 1 : i64, tpu.core_type = #tpu.core_type<tc>} {
    %c0 = arith.constant 0 : index
    %c0_0 = arith.constant 0 : index
    %0 = vector.load %arg0[%c0, %c0_0] : memref<8x128xf32, #tpu.memory_space<vmem>>, vector<8x128xf32>
    %c0_1 = arith.constant 0 : index
    %c0_2 = arith.constant 0 : index
    %1 = vector.load %arg1[%c0_1, %c0_2] : memref<128x512xf32, #tpu.memory_space<vmem>>, vector<128x512xf32>
    %cst = arith.constant dense<0.000000e+00> : vector<8x512xf32>
    %2 = tpu.matmul %0, %1, %cst {dimension_numbers = #tpu.dot_dimension_numbers<[1], [0], [0], [1], [0, 0, 1, 1], [], []>} : vector<8x128xf32>, vector<128x512xf32>, vector<8x512xf32> -> vector<8x512xf32>
    %c0_3 = arith.constant 0 : index
    %c0_4 = arith.constant 0 : index
    %3 = vector.load %arg3[%c0_3, %c0_4] : memref<1x512xf32, #tpu.memory_space<vmem>>, vector<1x512xf32>
    %4 = vector.broadcast %3 : vector<1x512xf32> to vector<8x512xf32>
    %5 = arith.addf %2, %4 : vector<8x512xf32>
    %c0_5 = arith.constant 0 : index
    %c0_6 = arith.constant 0 : index
    %6 = vector.load %arg6[%c0_5, %c0_6] : memref<8x512xf32, #tpu.memory_space<vmem>>, vector<8x512xf32>
    tpu.vector_store %arg6[%c0_5, %c0_6], %5 {strides = array<i32>} : memref<8x512xf32, #tpu.memory_space<vmem>>, vector<8x512xf32>,
    %c0_7 = arith.constant 0 : index
    %c0_8 = arith.constant 0 : index
    %7 = vector.load %arg2[%c0_7, %c0_8] : memref<128x512xf32, #tpu.memory_space<vmem>>, vector<128x512xf32>
    %cst_9 = arith.constant 0.000000e+00 : f32
    %8 = vector.broadcast %cst_9 : f32 to vector<1x128xf32>
    %cst_10 = arith.constant 0.000000e+00 : f32
    %9 = vector.broadcast %cst_10 : f32 to vector<1x128xf32>
    %c0_11 = arith.constant 0 : index
    %c0_12 = arith.constant 0 : index
    %10 = vector.load %arg6[%c0_11, %c0_12] : memref<8x512xf32, #tpu.memory_space<vmem>>, vector<1x512xf32>
    %cst_13 = arith.constant dense<0.000000e+00> : vector<1x512xf32>
    %11 = tpu.matmul %8, %7, %cst_13 {dimension_numbers = #tpu.dot_dimension_numbers<[1], [0], [0], [1], [0, 0, 1, 1], [], []>} : vector<1x128xf32>, vector<128x512xf32>, vector<1x512xf32> -> vector<1x512xf32>
    %12 = arith.addf %10, %11 : vector<1x512xf32>
    %13 = vector.extract_strided_slice %12 {offsets = [0, 0], sizes = [1, 128], strides = [1, 1]} : vector<1x512xf32> to vector<1x128xf32>
    %14 = arith.negf %13 : vector<1x128xf32>
    %15 = math.exp %14 : vector<1x128xf32>
    %cst_14 = arith.constant 1.000000e+00 : f32
    %16 = vector.broadcast %cst_14 : f32 to vector<1x128xf32>
    %17 = arith.addf %16, %15 : vector<1x128xf32>
    %18 = arith.divf %16, %17 : vector<1x128xf32>
    %19 = vector.extract_strided_slice %12 {offsets = [0, 128], sizes = [1, 128], strides = [1, 1]} : vector<1x512xf32> to vector<1x128xf32>
    %20 = arith.negf %19 : vector<1x128xf32>
    %21 = math.exp %20 : vector<1x128xf32>
    %cst_15 = arith.constant 1.000000e+00 : f32
    %22 = vector.broadcast %cst_15 : f32 to vector<1x128xf32>
    %23 = arith.addf %22, %21 : vector<1x128xf32>
    %24 = arith.divf %22, %23 : vector<1x128xf32>
    %25 = vector.extract_strided_slice %12 {offsets = [0, 256], sizes = [1, 128], strides = [1, 1]} : vector<1x512xf32> to vector<1x128xf32>
    %26 = math.tanh %25 : vector<1x128xf32>
    %27 = vector.extract_strided_slice %12 {offsets = [0, 384], sizes = [1, 128], strides = [1, 1]} : vector<1x512xf32> to vector<1x128xf32>
    %28 = arith.negf %27 : vector<1x128xf32>
    %29 = math.exp %28 : vector<1x128xf32>
    %cst_16 = arith.constant 1.000000e+00 : f32
    %30 = vector.broadcast %cst_16 : f32 to vector<1x128xf32>
    %31 = arith.addf %30, %29 : vector<1x128xf32>
    %32 = arith.divf %30, %31 : vector<1x128xf32>
    %33 = arith.mulf %24, %9 : vector<1x128xf32>
    %34 = arith.mulf %18, %26 : vector<1x128xf32>
    %35 = arith.addf %33, %34 : vector<1x128xf32>
    %36 = math.tanh %35 : vector<1x128xf32>
    %37 = arith.mulf %32, %36 : vector<1x128xf32>
    %c1 = arith.constant 1 : index
    %c0_17 = arith.constant 0 : index
    %38 = vector.load %arg6[%c1, %c0_17] : memref<8x512xf32, #tpu.memory_space<vmem>>, vector<1x512xf32>
    %cst_18 = arith.constant dense<0.000000e+00> : vector<1x512xf32>
    %39 = tpu.matmul %37, %7, %cst_18 {dimension_numbers = #tpu.dot_dimension_numbers<[1], [0], [0], [1], [0, 0, 1, 1], [], []>} : vector<1x128xf32>, vector<128x512xf32>, vector<1x512xf32> -> vector<1x512xf32>
    %40 = arith.addf %38, %39 : vector<1x512xf32>
    %41 = vector.extract_strided_slice %40 {offsets = [0, 0], sizes = [1, 128], strides = [1, 1]} : vector<1x512xf32> to vector<1x128xf32>
    %42 = arith.negf %41 : vector<1x128xf32>
    %43 = math.exp %42 : vector<1x128xf32>
    %cst_19 = arith.constant 1.000000e+00 : f32
    %44 = vector.broadcast %cst_19 : f32 to vector<1x128xf32>
    %45 = arith.addf %44, %43 : vector<1x128xf32>
    %46 = arith.divf %44, %45 : vector<1x128xf32>
    %47 = vector.extract_strided_slice %40 {offsets = [0, 128], sizes = [1, 128], strides = [1, 1]} : vector<1x512xf32> to vector<1x128xf32>
    %48 = arith.negf %47 : vector<1x128xf32>
    %49 = math.exp %48 : vector<1x128xf32>
    %cst_20 = arith.constant 1.000000e+00 : f32
    %50 = vector.broadcast %cst_20 : f32 to vector<1x128xf32>
    %51 = arith.addf %50, %49 : vector<1x128xf32>
    %52 = arith.divf %50, %51 : vector<1x128xf32>
    %53 = vector.extract_strided_slice %40 {offsets = [0, 256], sizes = [1, 128], strides = [1, 1]} : vector<1x512xf32> to vector<1x128xf32>
    %54 = math.tanh %53 : vector<1x128xf32>
    %55 = vector.extract_strided_slice %40 {offsets = [0, 384], sizes = [1, 128], strides = [1, 1]} : vector<1x512xf32> to vector<1x128xf32>
    %56 = arith.negf %55 : vector<1x128xf32>
    %57 = math.exp %56 : vector<1x128xf32>
    %cst_21 = arith.constant 1.000000e+00 : f32
    %58 = vector.broadcast %cst_21 : f32 to vector<1x128xf32>
    %59 = arith.addf %58, %57 : vector<1x128xf32>
    %60 = arith.divf %58, %59 : vector<1x128xf32>
    %61 = arith.mulf %52, %35 : vector<1x128xf32>
    %62 = arith.mulf %46, %54 : vector<1x128xf32>
    %63 = arith.addf %61, %62 : vector<1x128xf32>
    %64 = math.tanh %63 : vector<1x128xf32>
    %65 = arith.mulf %60, %64 : vector<1x128xf32>
    %c2 = arith.constant 2 : index
    %c0_22 = arith.constant 0 : index
    %66 = vector.load %arg6[%c2, %c0_22] : memref<8x512xf32, #tpu.memory_space<vmem>>, vector<1x512xf32>
    %cst_23 = arith.constant dense<0.000000e+00> : vector<1x512xf32>
    %67 = tpu.matmul %65, %7, %cst_23 {dimension_numbers = #tpu.dot_dimension_numbers<[1], [0], [0], [1], [0, 0, 1, 1], [], []>} : vector<1x128xf32>, vector<128x512xf32>, vector<1x512xf32> -> vector<1x512xf32>
    %68 = arith.addf %66, %67 : vector<1x512xf32>
    %69 = vector.extract_strided_slice %68 {offsets = [0, 0], sizes = [1, 128], strides = [1, 1]} : vector<1x512xf32> to vector<1x128xf32>
    %70 = arith.negf %69 : vector<1x128xf32>
    %71 = math.exp %70 : vector<1x128xf32>
    %cst_24 = arith.constant 1.000000e+00 : f32
    %72 = vector.broadcast %cst_24 : f32 to vector<1x128xf32>
    %73 = arith.addf %72, %71 : vector<1x128xf32>
    %74 = arith.divf %72, %73 : vector<1x128xf32>
    %75 = vector.extract_strided_slice %68 {offsets = [0, 128], sizes = [1, 128], strides = [1, 1]} : vector<1x512xf32> to vector<1x128xf32>
    %76 = arith.negf %75 : vector<1x128xf32>
    %77 = math.exp %76 : vector<1x128xf32>
    %cst_25 = arith.constant 1.000000e+00 : f32
    %78 = vector.broadcast %cst_25 : f32 to vector<1x128xf32>
    %79 = arith.addf %78, %77 : vector<1x128xf32>
    %80 = arith.divf %78, %79 : vector<1x128xf32>
    %81 = vector.extract_strided_slice %68 {offsets = [0, 256], sizes = [1, 128], strides = [1, 1]} : vector<1x512xf32> to vector<1x128xf32>
    %82 = math.tanh %81 : vector<1x128xf32>
    %83 = vector.extract_strided_slice %68 {offsets = [0, 384], sizes = [1, 128], strides = [1, 1]} : vector<1x512xf32> to vector<1x128xf32>
    %84 = arith.negf %83 : vector<1x128xf32>
    %85 = math.exp %84 : vector<1x128xf32>
    %cst_26 = arith.constant 1.000000e+00 : f32
    %86 = vector.broadcast %cst_26 : f32 to vector<1x128xf32>
    %87 = arith.addf %86, %85 : vector<1x128xf32>
    %88 = arith.divf %86, %87 : vector<1x128xf32>
    %89 = arith.mulf %80, %63 : vector<1x128xf32>
    %90 = arith.mulf %74, %82 : vector<1x128xf32>
    %91 = arith.addf %89, %90 : vector<1x128xf32>
    %92 = math.tanh %91 : vector<1x128xf32>
    %93 = arith.mulf %88, %92 : vector<1x128xf32>
    %c3 = arith.constant 3 : index
    %c0_27 = arith.constant 0 : index
    %94 = vector.load %arg6[%c3, %c0_27] : memref<8x512xf32, #tpu.memory_space<vmem>>, vector<1x512xf32>
    %cst_28 = arith.constant dense<0.000000e+00> : vector<1x512xf32>
    %95 = tpu.matmul %93, %7, %cst_28 {dimension_numbers = #tpu.dot_dimension_numbers<[1], [0], [0], [1], [0, 0, 1, 1], [], []>} : vector<1x128xf32>, vector<128x512xf32>, vector<1x512xf32> -> vector<1x512xf32>
    %96 = arith.addf %94, %95 : vector<1x512xf32>
    %97 = vector.extract_strided_slice %96 {offsets = [0, 0], sizes = [1, 128], strides = [1, 1]} : vector<1x512xf32> to vector<1x128xf32>
    %98 = arith.negf %97 : vector<1x128xf32>
    %99 = math.exp %98 : vector<1x128xf32>
    %cst_29 = arith.constant 1.000000e+00 : f32
    %100 = vector.broadcast %cst_29 : f32 to vector<1x128xf32>
    %101 = arith.addf %100, %99 : vector<1x128xf32>
    %102 = arith.divf %100, %101 : vector<1x128xf32>
    %103 = vector.extract_strided_slice %96 {offsets = [0, 128], sizes = [1, 128], strides = [1, 1]} : vector<1x512xf32> to vector<1x128xf32>
    %104 = arith.negf %103 : vector<1x128xf32>
    %105 = math.exp %104 : vector<1x128xf32>
    %cst_30 = arith.constant 1.000000e+00 : f32
    %106 = vector.broadcast %cst_30 : f32 to vector<1x128xf32>
    %107 = arith.addf %106, %105 : vector<1x128xf32>
    %108 = arith.divf %106, %107 : vector<1x128xf32>
    %109 = vector.extract_strided_slice %96 {offsets = [0, 256], sizes = [1, 128], strides = [1, 1]} : vector<1x512xf32> to vector<1x128xf32>
    %110 = math.tanh %109 : vector<1x128xf32>
    %111 = vector.extract_strided_slice %96 {offsets = [0, 384], sizes = [1, 128], strides = [1, 1]} : vector<1x512xf32> to vector<1x128xf32>
    %112 = arith.negf %111 : vector<1x128xf32>
    %113 = math.exp %112 : vector<1x128xf32>
    %cst_31 = arith.constant 1.000000e+00 : f32
    %114 = vector.broadcast %cst_31 : f32 to vector<1x128xf32>
    %115 = arith.addf %114, %113 : vector<1x128xf32>
    %116 = arith.divf %114, %115 : vector<1x128xf32>
    %117 = arith.mulf %108, %91 : vector<1x128xf32>
    %118 = arith.mulf %102, %110 : vector<1x128xf32>
    %119 = arith.addf %117, %118 : vector<1x128xf32>
    %120 = math.tanh %119 : vector<1x128xf32>
    %121 = arith.mulf %116, %120 : vector<1x128xf32>
    %c4 = arith.constant 4 : index
    %c0_32 = arith.constant 0 : index
    %122 = vector.load %arg6[%c4, %c0_32] : memref<8x512xf32, #tpu.memory_space<vmem>>, vector<1x512xf32>
    %cst_33 = arith.constant dense<0.000000e+00> : vector<1x512xf32>
    %123 = tpu.matmul %121, %7, %cst_33 {dimension_numbers = #tpu.dot_dimension_numbers<[1], [0], [0], [1], [0, 0, 1, 1], [], []>} : vector<1x128xf32>, vector<128x512xf32>, vector<1x512xf32> -> vector<1x512xf32>
    %124 = arith.addf %122, %123 : vector<1x512xf32>
    %125 = vector.extract_strided_slice %124 {offsets = [0, 0], sizes = [1, 128], strides = [1, 1]} : vector<1x512xf32> to vector<1x128xf32>
    %126 = arith.negf %125 : vector<1x128xf32>
    %127 = math.exp %126 : vector<1x128xf32>
    %cst_34 = arith.constant 1.000000e+00 : f32
    %128 = vector.broadcast %cst_34 : f32 to vector<1x128xf32>
    %129 = arith.addf %128, %127 : vector<1x128xf32>
    %130 = arith.divf %128, %129 : vector<1x128xf32>
    %131 = vector.extract_strided_slice %124 {offsets = [0, 128], sizes = [1, 128], strides = [1, 1]} : vector<1x512xf32> to vector<1x128xf32>
    %132 = arith.negf %131 : vector<1x128xf32>
    %133 = math.exp %132 : vector<1x128xf32>
    %cst_35 = arith.constant 1.000000e+00 : f32
    %134 = vector.broadcast %cst_35 : f32 to vector<1x128xf32>
    %135 = arith.addf %134, %133 : vector<1x128xf32>
    %136 = arith.divf %134, %135 : vector<1x128xf32>
    %137 = vector.extract_strided_slice %124 {offsets = [0, 256], sizes = [1, 128], strides = [1, 1]} : vector<1x512xf32> to vector<1x128xf32>
    %138 = math.tanh %137 : vector<1x128xf32>
    %139 = vector.extract_strided_slice %124 {offsets = [0, 384], sizes = [1, 128], strides = [1, 1]} : vector<1x512xf32> to vector<1x128xf32>
    %140 = arith.negf %139 : vector<1x128xf32>
    %141 = math.exp %140 : vector<1x128xf32>
    %cst_36 = arith.constant 1.000000e+00 : f32
    %142 = vector.broadcast %cst_36 : f32 to vector<1x128xf32>
    %143 = arith.addf %142, %141 : vector<1x128xf32>
    %144 = arith.divf %142, %143 : vector<1x128xf32>
    %145 = arith.mulf %136, %119 : vector<1x128xf32>
    %146 = arith.mulf %130, %138 : vector<1x128xf32>
    %147 = arith.addf %145, %146 : vector<1x128xf32>
    %148 = math.tanh %147 : vector<1x128xf32>
    %149 = arith.mulf %144, %148 : vector<1x128xf32>
    %c5 = arith.constant 5 : index
    %c0_37 = arith.constant 0 : index
    %150 = vector.load %arg6[%c5, %c0_37] : memref<8x512xf32, #tpu.memory_space<vmem>>, vector<1x512xf32>
    %cst_38 = arith.constant dense<0.000000e+00> : vector<1x512xf32>
    %151 = tpu.matmul %149, %7, %cst_38 {dimension_numbers = #tpu.dot_dimension_numbers<[1], [0], [0], [1], [0, 0, 1, 1], [], []>} : vector<1x128xf32>, vector<128x512xf32>, vector<1x512xf32> -> vector<1x512xf32>
    %152 = arith.addf %150, %151 : vector<1x512xf32>
    %153 = vector.extract_strided_slice %152 {offsets = [0, 0], sizes = [1, 128], strides = [1, 1]} : vector<1x512xf32> to vector<1x128xf32>
    %154 = arith.negf %153 : vector<1x128xf32>
    %155 = math.exp %154 : vector<1x128xf32>
    %cst_39 = arith.constant 1.000000e+00 : f32
    %156 = vector.broadcast %cst_39 : f32 to vector<1x128xf32>
    %157 = arith.addf %156, %155 : vector<1x128xf32>
    %158 = arith.divf %156, %157 : vector<1x128xf32>
    %159 = vector.extract_strided_slice %152 {offsets = [0, 128], sizes = [1, 128], strides = [1, 1]} : vector<1x512xf32> to vector<1x128xf32>
    %160 = arith.negf %159 : vector<1x128xf32>
    %161 = math.exp %160 : vector<1x128xf32>
    %cst_40 = arith.constant 1.000000e+00 : f32
    %162 = vector.broadcast %cst_40 : f32 to vector<1x128xf32>
    %163 = arith.addf %162, %161 : vector<1x128xf32>
    %164 = arith.divf %162, %163 : vector<1x128xf32>
    %165 = vector.extract_strided_slice %152 {offsets = [0, 256], sizes = [1, 128], strides = [1, 1]} : vector<1x512xf32> to vector<1x128xf32>
    %166 = math.tanh %165 : vector<1x128xf32>
    %167 = vector.extract_strided_slice %152 {offsets = [0, 384], sizes = [1, 128], strides = [1, 1]} : vector<1x512xf32> to vector<1x128xf32>
    %168 = arith.negf %167 : vector<1x128xf32>
    %169 = math.exp %168 : vector<1x128xf32>
    %cst_41 = arith.constant 1.000000e+00 : f32
    %170 = vector.broadcast %cst_41 : f32 to vector<1x128xf32>
    %171 = arith.addf %170, %169 : vector<1x128xf32>
    %172 = arith.divf %170, %171 : vector<1x128xf32>
    %173 = arith.mulf %164, %147 : vector<1x128xf32>
    %174 = arith.mulf %158, %166 : vector<1x128xf32>
    %175 = arith.addf %173, %174 : vector<1x128xf32>
    %176 = math.tanh %175 : vector<1x128xf32>
    %177 = arith.mulf %172, %176 : vector<1x128xf32>
    %c6 = arith.constant 6 : index
    %c0_42 = arith.constant 0 : index
    %178 = vector.load %arg6[%c6, %c0_42] : memref<8x512xf32, #tpu.memory_space<vmem>>, vector<1x512xf32>
    %cst_43 = arith.constant dense<0.000000e+00> : vector<1x512xf32>
    %179 = tpu.matmul %177, %7, %cst_43 {dimension_numbers = #tpu.dot_dimension_numbers<[1], [0], [0], [1], [0, 0, 1, 1], [], []>} : vector<1x128xf32>, vector<128x512xf32>, vector<1x512xf32> -> vector<1x512xf32>
    %180 = arith.addf %178, %179 : vector<1x512xf32>
    %181 = vector.extract_strided_slice %180 {offsets = [0, 0], sizes = [1, 128], strides = [1, 1]} : vector<1x512xf32> to vector<1x128xf32>
    %182 = arith.negf %181 : vector<1x128xf32>
    %183 = math.exp %182 : vector<1x128xf32>
    %cst_44 = arith.constant 1.000000e+00 : f32
    %184 = vector.broadcast %cst_44 : f32 to vector<1x128xf32>
    %185 = arith.addf %184, %183 : vector<1x128xf32>
    %186 = arith.divf %184, %185 : vector<1x128xf32>
    %187 = vector.extract_strided_slice %180 {offsets = [0, 128], sizes = [1, 128], strides = [1, 1]} : vector<1x512xf32> to vector<1x128xf32>
    %188 = arith.negf %187 : vector<1x128xf32>
    %189 = math.exp %188 : vector<1x128xf32>
    %cst_45 = arith.constant 1.000000e+00 : f32
    %190 = vector.broadcast %cst_45 : f32 to vector<1x128xf32>
    %191 = arith.addf %190, %189 : vector<1x128xf32>
    %192 = arith.divf %190, %191 : vector<1x128xf32>
    %193 = vector.extract_strided_slice %180 {offsets = [0, 256], sizes = [1, 128], strides = [1, 1]} : vector<1x512xf32> to vector<1x128xf32>
    %194 = math.tanh %193 : vector<1x128xf32>
    %195 = vector.extract_strided_slice %180 {offsets = [0, 384], sizes = [1, 128], strides = [1, 1]} : vector<1x512xf32> to vector<1x128xf32>
    %196 = arith.negf %195 : vector<1x128xf32>
    %197 = math.exp %196 : vector<1x128xf32>
    %cst_46 = arith.constant 1.000000e+00 : f32
    %198 = vector.broadcast %cst_46 : f32 to vector<1x128xf32>
    %199 = arith.addf %198, %197 : vector<1x128xf32>
    %200 = arith.divf %198, %199 : vector<1x128xf32>
    %201 = arith.mulf %192, %175 : vector<1x128xf32>
    %202 = arith.mulf %186, %194 : vector<1x128xf32>
    %203 = arith.addf %201, %202 : vector<1x128xf32>
    %204 = math.tanh %203 : vector<1x128xf32>
    %205 = arith.mulf %200, %204 : vector<1x128xf32>
    %c7 = arith.constant 7 : index
    %c0_47 = arith.constant 0 : index
    %206 = vector.load %arg6[%c7, %c0_47] : memref<8x512xf32, #tpu.memory_space<vmem>>, vector<1x512xf32>
    %cst_48 = arith.constant dense<0.000000e+00> : vector<1x512xf32>
    %207 = tpu.matmul %205, %7, %cst_48 {dimension_numbers = #tpu.dot_dimension_numbers<[1], [0], [0], [1], [0, 0, 1, 1], [], []>} : vector<1x128xf32>, vector<128x512xf32>, vector<1x512xf32> -> vector<1x512xf32>
    %208 = arith.addf %206, %207 : vector<1x512xf32>
    %209 = vector.extract_strided_slice %208 {offsets = [0, 0], sizes = [1, 128], strides = [1, 1]} : vector<1x512xf32> to vector<1x128xf32>
    %210 = arith.negf %209 : vector<1x128xf32>
    %211 = math.exp %210 : vector<1x128xf32>
    %cst_49 = arith.constant 1.000000e+00 : f32
    %212 = vector.broadcast %cst_49 : f32 to vector<1x128xf32>
    %213 = arith.addf %212, %211 : vector<1x128xf32>
    %214 = arith.divf %212, %213 : vector<1x128xf32>
    %215 = vector.extract_strided_slice %208 {offsets = [0, 128], sizes = [1, 128], strides = [1, 1]} : vector<1x512xf32> to vector<1x128xf32>
    %216 = arith.negf %215 : vector<1x128xf32>
    %217 = math.exp %216 : vector<1x128xf32>
    %cst_50 = arith.constant 1.000000e+00 : f32
    %218 = vector.broadcast %cst_50 : f32 to vector<1x128xf32>
    %219 = arith.addf %218, %217 : vector<1x128xf32>
    %220 = arith.divf %218, %219 : vector<1x128xf32>
    %221 = vector.extract_strided_slice %208 {offsets = [0, 256], sizes = [1, 128], strides = [1, 1]} : vector<1x512xf32> to vector<1x128xf32>
    %222 = math.tanh %221 : vector<1x128xf32>
    %223 = vector.extract_strided_slice %208 {offsets = [0, 384], sizes = [1, 128], strides = [1, 1]} : vector<1x512xf32> to vector<1x128xf32>
    %224 = arith.negf %223 : vector<1x128xf32>
    %225 = math.exp %224 : vector<1x128xf32>
    %cst_51 = arith.constant 1.000000e+00 : f32
    %226 = vector.broadcast %cst_51 : f32 to vector<1x128xf32>
    %227 = arith.addf %226, %225 : vector<1x128xf32>
    %228 = arith.divf %226, %227 : vector<1x128xf32>
    %229 = arith.mulf %220, %203 : vector<1x128xf32>
    %230 = arith.mulf %214, %222 : vector<1x128xf32>
    %231 = arith.addf %229, %230 : vector<1x128xf32>
    %232 = math.tanh %231 : vector<1x128xf32>
    %233 = arith.mulf %228, %232 : vector<1x128xf32>
    %c0_52 = arith.constant 0 : index
    %c0_53 = arith.constant 0 : index
    %234 = vector.load %arg4[%c0_52, %c0_53] : memref<1x128xf32, #tpu.memory_space<vmem>>, vector<1x128xf32>
    tpu.vector_store %arg4[%c0_52, %c0_53], %233 {strides = array<i32>} : memref<1x128xf32, #tpu.memory_space<vmem>>, vector<1x128xf32>,
    %c0_54 = arith.constant 0 : index
    %c0_55 = arith.constant 0 : index
    %235 = vector.load %arg5[%c0_54, %c0_55] : memref<1x128xf32, #tpu.memory_space<vmem>>, vector<1x128xf32>
    tpu.vector_store %arg5[%c0_54, %c0_55], %231 {strides = array<i32>} : memref<1x128xf32, #tpu.memory_space<vmem>>, vector<1x128xf32>,
    return
  }
}

</mosaic_0001>

<bundles_post_ra>
// kernel: tpu_custom_call.1
= control target key start
LH: loop header
LB: loop body
LE: loop exit
PB: predicated region body
PF: predicated region fallthrough
CT: control target
= control target key end

     0   :  { %11 = vsyncpa [#allocation4], 0  ;;  %s2910_s0 = inlined_call_operand.hbm [shape: f32[8,128], index: 0, kind: input, shape index: {}]   ;;  %s2911_s1 = inlined_call_operand.hbm [shape: f32[128,512], index: 1, kind: input, shape index: {}]   ;;  %s2912_s2 = inlined_call_operand.hbm [shape: f32[128,512], index: 2, kind: input, shape index: {}]   ;;  %s2913_s3 = inlined_call_operand.hbm [shape: f32[1,512], index: 3, kind: input, shape index: {}]   ;;  %s2914_s4 = inlined_call_operand.hbm [shape: f32[1,128], index: 4, kind: output, shape index: {0}]   ;;  %s2915_s5 = inlined_call_operand.hbm [shape: f32[1,128], index: 5, kind: output, shape index: {1}]  }
   0x1   :  { %12 = vsyncpa [#allocation7], 0 }
   0x2   :  { %13 = vsyncpa [#allocation10], 0 }
   0x3   :  { %14 = vsyncpa [#allocation5], 0  ;;  %s31_s20 = sshll.u32 %s2911_s1, 4  ;;  %s32_s20 = int_to_ptr.hbm [resolvable:$true] %s31_s20 }
   0x4   :  { %15 = vsyncpa [#allocation13], 0  ;;  %s2033_s21 = smov [#allocation6]   ;;  %s21_s25 = sshll.u32 %s2910_s0, 4  ;;  %s22_s25 = int_to_ptr.hbm [resolvable:$true] %s21_s25 }
   0x5   :  { %s33_s22 = sshll.u32 %s2033_s21, 4  ;;  %s2034_s26 = smov 512   ;;  %s34_s22 = int_to_ptr.vmem [resolvable:$true] %s33_s22 }
   0x6   :  { %s2035_s27 = smov 32   ;;  %s2036_s28 = smov [#allocation3]  }
   0x7   :  { %39 = dma.hbm_to_vmem [thread:$0]  %s32_s20, 8192, %s34_s22, [#allocation7], %s2034_s26, %s2034_s26, %s2035_s27  }
   0x8   :  { %s23_s29 = sshll.u32 %s2036_s28, 4  ;;  %s44_s7 = sshll.u32 %s2912_s2, 4  ;;  %s24_s29 = int_to_ptr.vmem [resolvable:$true] %s23_s29  ;;  %s45_s7 = int_to_ptr.hbm [resolvable:$true] %s44_s7 }
   0x9   :  { %26 = dma.hbm_to_vmem [thread:$0]  %s22_s25, 128, %s24_s29, [#allocation4]  }
   0xa   :  { %s58_s9 = sshll.u32 %s2913_s3, 4  ;;  %s2037_s10 = smov [#allocation8]   ;;  %s59_s9 = int_to_ptr.hbm [resolvable:$true] %s58_s9 }
   0xb   :  { %s46_s11 = sshll.u32 %s2037_s10, 4  ;;  %s2038_s0 = smov [#allocation9]   ;;  %s47_s11 = int_to_ptr.vmem [resolvable:$true] %s46_s11 }
   0xc   :  { %52 = dma.hbm_to_vmem [thread:$0]  %s45_s7, 8192, %s47_s11, [#allocation7], %s2034_s26, %s2034_s26, %s2035_s27  }
   0xd   :  { %s60_s12 = sshll.u32 %s2038_s0, 4  ;;  %s61_s12 = int_to_ptr.vmem [resolvable:$true] %s60_s12 }
   0xe   :  { %63 = dma.hbm_to_vmem [thread:$0]  %s59_s9, 64, %s61_s12, [#allocation10]  }
   0xf   :  { %2023 = dma.done.wait [#allocation4], 128  }
  0x10   :  { %2024 = vsyncadd [#allocation4], 4294967168 }
  0x11   :  { %2025 = dma.done.wait [#allocation7], 16384  }
  0x12   :  { %2026 = vsyncadd [#allocation7], 4294950912 }
  0x13   :  { %2027 = dma.done.wait [#allocation10], 64  }
  0x14   :  { %2028 = vsyncadd [#allocation10], 4294967232  ;;  %v143_v0 = vld [vmem:[#allocation6 + $0x1f0] sm:$0xff]  ;;  %v144_v1 = vld [vmem:[#allocation6 + $0x1f8] sm:$0xff]  ;;  %vm393_vm0 = vcmask 1042434   ;;  %vm391_vm1 = vcmask 1040384  }
  0x15   :  { %v139_v2 = vld [vmem:[#allocation6 + $0x1d0] sm:$0xff]  ;;  %195 = vmatpush.msra.mxu2 %v143_v0  ;;  %215 = vmatpush.msra.mxu3 %v144_v1  ;;  %v140_v3 = vld [vmem:[#allocation6 + $0x1d8] sm:$0xff]  ;;  %v142_v6 = vld [vmem:[#allocation6 + $0x1e8] sm:$0xff]  ;;  %vm395_vm2 = vcmask 1041408   ;;  %s2040_s2 = smov [#allocation12]   ;;  %s1637_s15 = sshll.u32 %s2915_s5, 4  ;;  %s1638_s15 = int_to_ptr.hbm [resolvable:$true] %s1637_s15 }
  0x16   :  { %v135_v4 = vld [vmem:[#allocation6 + $0x1b0] sm:$0xff]  ;;  %v136_v5 = vld [vmem:[#allocation6 + $0x1b8] sm:$0xff]  ;;  %v141_v7 = vld [vmem:[#allocation6 + $0x1e0] sm:$0xff]  ;;  %175 = vmatpush.msra.mxu1 %v142_v6  ;;  %s1635_s3 = sshll.u32 %s2040_s2, 4  ;;  %s2041_s16 = smov [#allocation11]   ;;  %s1636_s3 = int_to_ptr.vmem [resolvable:$true] %s1635_s3 }
  0x17   :  { %196 = vmatpush.msra.mxu2 %v139_v2  ;;  %216 = vmatpush.msra.mxu3 %v140_v3  ;;  %v138_v8 = vld [vmem:[#allocation6 + $0x1c8] sm:$0xff]  ;;  %v131_v9 = vld [vmem:[#allocation6 + $0x190] sm:$0xff]  ;;  %v132_v10 = vld [vmem:[#allocation6 + $0x198] sm:$0xff]  ;;  %s1624_s17 = sshll.u32 %s2041_s16, 4  ;;  %s1626_s19 = sshll.u32 %s2914_s4, 4  ;;  %s1625_s17 = int_to_ptr.vmem [resolvable:$true] %s1624_s17  ;;  %s1627_s19 = int_to_ptr.hbm [resolvable:$true] %s1626_s19 }
  0x18   :  { %155 = vmatpush.msra.mxu0 %v141_v7  ;;  %v137_v11 = vld [vmem:[#allocation6 + $0x1c0] sm:$0xff]  ;;  %v134_v12 = vld [vmem:[#allocation6 + $0x1a8] sm:$0xff]  ;;  %176 = vmatpush.msra.mxu1 %v138_v8  ;;  %v127_v14 = vld [vmem:[#allocation6 + $0x170] sm:$0xff] }
  0x19   :  { %197 = vmatpush.msra.mxu2 %v135_v4  ;;  %217 = vmatpush.msra.mxu3 %v136_v5  ;;  %v133_v13 = vld [vmem:[#allocation6 + $0x1a0] sm:$0xff]  ;;  %v128_v15 = vld [vmem:[#allocation6 + $0x178] sm:$0xff]  ;;  %v130_v16 = vld [vmem:[#allocation6 + $0x188] sm:$0xff] }
  0x1a   :  { %156 = vmatpush.msra.mxu0 %v137_v11  ;;  %v129_v17 = vld [vmem:[#allocation6 + $0x180] sm:$0xff]  ;;  %177 = vmatpush.msra.mxu1 %v134_v12  ;;  %v123_v18 = vld [vmem:[#allocation6 + $0x150] sm:$0xff]  ;;  %v124_v19 = vld [vmem:[#allocation6 + $0x158] sm:$0xff] }
  0x1b   :  { %198 = vmatpush.msra.mxu2 %v131_v9  ;;  %218 = vmatpush.msra.mxu3 %v132_v10  ;;  %v126_v20 = vld [vmem:[#allocation6 + $0x168] sm:$0xff]  ;;  %v125_v21 = vld [vmem:[#allocation6 + $0x160] sm:$0xff]  ;;  %v119_v22 = vld [vmem:[#allocation6 + $0x130] sm:$0xff] }
  0x1c   :  { %157 = vmatpush.msra.mxu0 %v133_v13  ;;  %178 = vmatpush.msra.mxu1 %v130_v16  ;;  %v120_v23 = vld [vmem:[#allocation6 + $0x138] sm:$0xff]  ;;  %v122_v24 = vld [vmem:[#allocation6 + $0x148] sm:$0xff]  ;;  %v121_v25 = vld [vmem:[#allocation6 + $0x140] sm:$0xff] }
  0x1d   :  { %199 = vmatpush.msra.mxu2 %v127_v14  ;;  %219 = vmatpush.msra.mxu3 %v128_v15  ;;  %v115_v26 = vld [vmem:[#allocation6 + $0x110] sm:$0xff]  ;;  %v116_v27 = vld [vmem:[#allocation6 + $0x118] sm:$0xff]  ;;  %v118_v28 = vld [vmem:[#allocation6 + $0x128] sm:$0xff] }
  0x1e   :  { %158 = vmatpush.msra.mxu0 %v129_v17  ;;  %179 = vmatpush.msra.mxu1 %v126_v20  ;;  %v117_v29 = vld [vmem:[#allocation6 + $0x120] sm:$0xff]  ;;  %v111_v30 = vld [vmem:[#allocation6 + $0xf0] sm:$0xff]  ;;  %v112_v31 = vld [vmem:[#allocation6 + $0xf8] sm:$0xff] }
  0x1f   :  { %200 = vmatpush.msra.mxu2 %v123_v18  ;;  %220 = vmatpush.msra.mxu3 %v124_v19  ;;  %v114_v32 = vld [vmem:[#allocation6 + $0x108] sm:$0xff]  ;;  %v113_v33 = vld [vmem:[#allocation6 + $0x100] sm:$0xff]  ;;  %v107_v34 = vld [vmem:[#allocation6 + $0xd0] sm:$0xff] }
  0x20   :  { %159 = vmatpush.msra.mxu0 %v125_v21  ;;  %180 = vmatpush.msra.mxu1 %v122_v24  ;;  %v108_v35 = vld [vmem:[#allocation6 + $0xd8] sm:$0xff]  ;;  %v110_v36 = vld [vmem:[#allocation6 + $0xe8] sm:$0xff]  ;;  %v109_v37 = vld [vmem:[#allocation6 + $0xe0] sm:$0xff] }
  0x21   :  { %201 = vmatpush.msra.mxu2 %v119_v22  ;;  %221 = vmatpush.msra.mxu3 %v120_v23  ;;  %v103_v38 = vld [vmem:[#allocation6 + $0xb0] sm:$0xff]  ;;  %v104_v39 = vld [vmem:[#allocation6 + $0xb8] sm:$0xff]  ;;  %v106_v40 = vld [vmem:[#allocation6 + $0xc8] sm:$0xff] }
  0x22   :  { %160 = vmatpush.msra.mxu0 %v121_v25  ;;  %181 = vmatpush.msra.mxu1 %v118_v28  ;;  %v105_v41 = vld [vmem:[#allocation6 + $0xc0] sm:$0xff]  ;;  %v99_v42 = vld [vmem:[#allocation6 + $0x90] sm:$0xff]  ;;  %v100_v43 = vld [vmem:[#allocation6 + $0x98] sm:$0xff] }
  0x23   :  { %202 = vmatpush.msra.mxu2 %v115_v26  ;;  %222 = vmatpush.msra.mxu3 %v116_v27  ;;  %v102_v44 = vld [vmem:[#allocation6 + $0xa8] sm:$0xff]  ;;  %v101_v45 = vld [vmem:[#allocation6 + $0xa0] sm:$0xff]  ;;  %v95_v46 = vld [vmem:[#allocation6 + $0x70] sm:$0xff] }
  0x24   :  { %161 = vmatpush.msra.mxu0 %v117_v29  ;;  %182 = vmatpush.msra.mxu1 %v114_v32  ;;  %v96_v47 = vld [vmem:[#allocation6 + $0x78] sm:$0xff]  ;;  %v98_v48 = vld [vmem:[#allocation6 + $0x88] sm:$0xff]  ;;  %v97_v49 = vld [vmem:[#allocation6 + $0x80] sm:$0xff] }
  0x25   :  { %203 = vmatpush.msra.mxu2 %v111_v30  ;;  %223 = vmatpush.msra.mxu3 %v112_v31  ;;  %v91_v50 = vld [vmem:[#allocation6 + $0x50] sm:$0xff]  ;;  %v92_v51 = vld [vmem:[#allocation6 + $0x58] sm:$0xff]  ;;  %v94_v52 = vld [vmem:[#allocation6 + $0x68] sm:$0xff] }
  0x26   :  { %162 = vmatpush.msra.mxu0 %v113_v33  ;;  %183 = vmatpush.msra.mxu1 %v110_v36  ;;  %v93_v53 = vld [vmem:[#allocation6 + $0x60] sm:$0xff]  ;;  %v87_v54 = vld [vmem:[#allocation6 + $0x30] sm:$0xff]  ;;  %v88_v55 = vld [vmem:[#allocation6 + $0x38] sm:$0xff] }
  0x27   :  { %204 = vmatpush.msra.mxu2 %v107_v34  ;;  %224 = vmatpush.msra.mxu3 %v108_v35  ;;  %v90_v56 = vld [vmem:[#allocation6 + $0x48] sm:$0xff]  ;;  %v89_v57 = vld [vmem:[#allocation6 + $0x40] sm:$0xff]  ;;  %v83_v58 = vld [vmem:[#allocation6 + $0x10] sm:$0xff] }
  0x28   :  { %163 = vmatpush.msra.mxu0 %v109_v37  ;;  %184 = vmatpush.msra.mxu1 %v106_v40  ;;  %v84_v59 = vld [vmem:[#allocation6 + $0x18] sm:$0xff]  ;;  %v2084_v60 = vld [vmem:[#allocation8 + $0x1f0] sm:$0xff]  ;;  %v86_v62 = vld [vmem:[#allocation6 + $0x28] sm:$0xff] }
  0x29   :  { %205 = vmatpush.msra.mxu2 %v103_v38  ;;  %225 = vmatpush.msra.mxu3 %v104_v39  ;;  %v2086_v61 = vld [vmem:[#allocation8 + $0x1f8] sm:$0xff]  ;;  %v85_v63 = vld [vmem:[#allocation6 + $0x20] sm:$0xff]  ;;  %v2088_v0 = vld [vmem:[#allocation8 + $0x1d0] sm:$0xff] }
  0x2a   :  { %164 = vmatpush.msra.mxu0 %v105_v41  ;;  %185 = vmatpush.msra.mxu1 %v102_v44  ;;  %v2090_v1 = vld [vmem:[#allocation8 + $0x1d8] sm:$0xff]  ;;  %v82_v2 = vld [vmem:[#allocation6 + $0x8] sm:$0xff]  ;;  %v81_v3 = vld [vmem:[#allocation6] sm:$0xff] }
  0x2b   :  { %206 = vmatpush.msra.mxu2 %v99_v42  ;;  %226 = vmatpush.msra.mxu3 %v100_v43  ;;  %v2094_v4 = vld [vmem:[#allocation8 + $0x1b0] sm:$0xff]  ;;  %v2096_v5 = vld [vmem:[#allocation8 + $0x1b8] sm:$0xff]  ;;  %v2100_v6 = vld [vmem:[#allocation8 + $0x1e8] sm:$0xff] }
  0x2c   :  { %165 = vmatpush.msra.mxu0 %v101_v45  ;;  %186 = vmatpush.msra.mxu1 %v98_v48  ;;  %v2102_v7 = vld [vmem:[#allocation8 + $0x1e0] sm:$0xff]  ;;  %v2104_v8 = vld [vmem:[#allocation8 + $0x190] sm:$0xff]  ;;  %v2106_v9 = vld [vmem:[#allocation8 + $0x198] sm:$0xff] }
  0x2d   :  { %207 = vmatpush.msra.mxu2 %v95_v46  ;;  %227 = vmatpush.msra.mxu3 %v96_v47  ;;  %v2110_v10 = vld [vmem:[#allocation8 + $0x1c8] sm:$0xff]  ;;  %v2112_v11 = vld [vmem:[#allocation8 + $0x1c0] sm:$0xff]  ;;  %v2116_v12 = vld [vmem:[#allocation8 + $0x170] sm:$0xff] }
  0x2e   :  { %166 = vmatpush.msra.mxu0 %v97_v49  ;;  %187 = vmatpush.msra.mxu1 %v94_v52  ;;  %v2118_v13 = vld [vmem:[#allocation8 + $0x178] sm:$0xff]  ;;  %v2122_v14 = vld [vmem:[#allocation8 + $0x1a8] sm:$0xff]  ;;  %v2124_v15 = vld [vmem:[#allocation8 + $0x1a0] sm:$0xff] }
  0x2f   :  { %208 = vmatpush.msra.mxu2 %v91_v50  ;;  %228 = vmatpush.msra.mxu3 %v92_v51  ;;  %v2128_v16 = vld [vmem:[#allocation8 + $0x150] sm:$0xff]  ;;  %v2130_v17 = vld [vmem:[#allocation8 + $0x158] sm:$0xff]  ;;  %v2134_v18 = vld [vmem:[#allocation8 + $0x188] sm:$0xff] }
  0x30   :  { %167 = vmatpush.msra.mxu0 %v93_v53  ;;  %188 = vmatpush.msra.mxu1 %v90_v56  ;;  %v2136_v19 = vld [vmem:[#allocation8 + $0x180] sm:$0xff]  ;;  %v2140_v20 = vld [vmem:[#allocation8 + $0x130] sm:$0xff]  ;;  %v2142_v21 = vld [vmem:[#allocation8 + $0x138] sm:$0xff] }
  0x31   :  { %209 = vmatpush.msra.mxu2 %v87_v54  ;;  %229 = vmatpush.msra.mxu3 %v88_v55  ;;  %v2146_v22 = vld [vmem:[#allocation8 + $0x168] sm:$0xff]  ;;  %v2148_v23 = vld [vmem:[#allocation8 + $0x160] sm:$0xff]  ;;  %v2152_v24 = vld [vmem:[#allocation8 + $0x110] sm:$0xff] }
  0x32   :  { %168 = vmatpush.msra.mxu0 %v89_v57  ;;  %189 = vmatpush.msra.mxu1 %v86_v62  ;;  %v2154_v25 = vld [vmem:[#allocation8 + $0x118] sm:$0xff]  ;;  %v2158_v26 = vld [vmem:[#allocation8 + $0x148] sm:$0xff]  ;;  %v2160_v27 = vld [vmem:[#allocation8 + $0x140] sm:$0xff]  ;;  %v2039_v62 = vmov 0.0  }
  0x33   :  { %210 = vmatpush.msra.mxu2 %v83_v58  ;;  %230 = vmatpush.msra.mxu3 %v84_v59  ;;  %v2164_v28 = vld [vmem:[#allocation8 + $0xf0] sm:$0xff]  ;;  %v2166_v29 = vld [vmem:[#allocation8 + $0xf8] sm:$0xff]  ;;  %v2170_v30 = vld [vmem:[#allocation8 + $0x128] sm:$0xff] }
  0x34   :  { %169 = vmatpush.msra.mxu0 %v85_v63  ;;  %190 = vmatpush.msra.mxu1 %v82_v2  ;;  %v2172_v31 = vld [vmem:[#allocation8 + $0x120] sm:$0xff]  ;;  %v2176_v32 = vld [vmem:[#allocation8 + $0xd0] sm:$0xff]  ;;  %v2178_v33 = vld [vmem:[#allocation8 + $0xd8] sm:$0xff] }
  0x35   :  { %344 = vmatpush.msrb.mxu2 %v2084_v60  ;;  %364 = vmatpush.msrb.mxu3 %v2086_v61  ;;  %3023 = vst [vmem:[#allocation19_spill] sm:$0xff] %v2176_v32  ;;  %v2182_v34 = vld [vmem:[#allocation8 + $0x108] sm:$0xff]  ;;  %v2184_v35 = vld [vmem:[#allocation8 + $0x100] sm:$0xff]  ;;  %v2188_v36 = vld [vmem:[#allocation8 + $0xb0] sm:$0xff] }
  0x36   :  { %170 = vmatpush.msra.mxu0 %v81_v3  ;;  %324 = vmatpush.msrb.mxu1 %v2100_v6  ;;  %3024 = vst [vmem:[#allocation20_spill] sm:$0xff] %v2178_v33  ;;  %v2190_v37 = vld [vmem:[#allocation8 + $0xb8] sm:$0xff]  ;;  %v2194_v38 = vld [vmem:[#allocation8 + $0xe8] sm:$0xff]  ;;  %v2198_v40 = vld [vmem:[#allocation8 + $0x90] sm:$0xff] }
  0x37   :  { %345 = vmatpush.msrb.mxu2 %v2088_v0  ;;  %365 = vmatpush.msrb.mxu3 %v2090_v1  ;;  %3025 = vst [vmem:[#allocation21_spill] sm:$0xff] %v2188_v36  ;;  %v80_v39 = vld [vmem:[#allocation3] sm:$0xff]  ;;  %v2204_v42 = vld [vmem:[#allocation8 + $0xe0] sm:$0xff]  ;;  %v2207_v43 = vld [vmem:[#allocation8 + $0xc8] sm:$0xff] }
  0x38   :  { %304 = vmatpush.msrb.mxu0 %v2102_v7  ;;  %325 = vmatpush.msrb.mxu1 %v2110_v10  ;;  %3026 = vst [vmem:[#allocation22_spill] sm:$0xff] %v2190_v37  ;;  %v2200_v41 = vld [vmem:[#allocation8 + $0x98] sm:$0xff]  ;;  %v2209_v44 = vld [vmem:[#allocation8 + $0x70] sm:$0xff]  ;;  %v2215_v46 = vld [vmem:[#allocation8 + $0xc0] sm:$0xff] }
  0x39   :  { %346 = vmatpush.msrb.mxu2 %v2094_v4  ;;  %366 = vmatpush.msrb.mxu3 %v2096_v5  ;;  %3027 = vst [vmem:[#allocation23_spill] sm:$0xff] %v2198_v40  ;;  %v2213_v45 = vld [vmem:[#allocation8 + $0x78] sm:$0xff]  ;;  %v2218_v47 = vld [vmem:[#allocation8 + $0xa8] sm:$0xff]  ;;  %v2220_v48 = vld [vmem:[#allocation8 + $0x50] sm:$0xff] }
  0x3a   :  { %305 = vmatpush.msrb.mxu0 %v2112_v11  ;;  %326 = vmatpush.msrb.mxu1 %v2122_v14  ;;  %3028 = vst [vmem:[#allocation24_spill] sm:$0xff] %v2200_v41  ;;  %v2224_v49 = vld [vmem:[#allocation8 + $0x58] sm:$0xff]  ;;  %v2226_v50 = vld [vmem:[#allocation8 + $0xa0] sm:$0xff]  ;;  %v2230_v51 = vld [vmem:[#allocation8 + $0x88] sm:$0xff] }
  0x3b   :  { %347 = vmatpush.msrb.mxu2 %v2104_v8  ;;  %367 = vmatpush.msrb.mxu3 %v2106_v9  ;;  %3029 = vst [vmem:[#allocation25_spill] sm:$0xff] %v2209_v44  ;;  %v2232_v52 = vld [vmem:[#allocation8 + $0x30] sm:$0xff]  ;;  %v2236_v53 = vld [vmem:[#allocation8 + $0x38] sm:$0xff]  ;;  %v2240_v54 = vld [vmem:[#allocation8 + $0x80] sm:$0xff] }
  0x3c   :  { %306 = vmatpush.msrb.mxu0 %v2124_v15  ;;  %327 = vmatpush.msrb.mxu1 %v2134_v18  ;;  %3030 = vst [vmem:[#allocation26_spill] sm:$0xff] %v2213_v45  ;;  %v2244_v55 = vld [vmem:[#allocation8 + $0x68] sm:$0xff]  ;;  %v2246_v56 = vld [vmem:[#allocation8 + $0x10] sm:$0xff]  ;;  %v2249_v57 = vld [vmem:[#allocation8 + $0x18] sm:$0xff] }
  0x3d   :  { %348 = vmatpush.msrb.mxu2 %v2116_v12  ;;  %368 = vmatpush.msrb.mxu3 %v2118_v13  ;;  %3031 = vst [vmem:[#allocation27_spill] sm:$0xff] %v2218_v47  ;;  %v2252_v58 = vld [vmem:[#allocation8 + $0x60] sm:$0xff]  ;;  %v2256_v59 = vld [vmem:[#allocation8 + $0x48] sm:$0xff] }
  0x3e   :  { %307 = vmatpush.msrb.mxu0 %v2136_v19  ;;  %328 = vmatpush.msrb.mxu1 %v2146_v22  ;;  %3032 = vst [vmem:[#allocation28_spill] sm:$0xff] %v2220_v48  ;;  %v2259_v63 = vld [vmem:[#allocation8 + $0x40] sm:$0xff]  ;;  %v2262_v2 = vld [vmem:[#allocation8 + $0x28] sm:$0xff] }
  0x3f   :  { %349 = vmatpush.msrb.mxu2 %v2128_v16  ;;  %369 = vmatpush.msrb.mxu3 %v2130_v17  ;;  %3033 = vst [vmem:[#allocation29_spill] sm:$0xff] %v2224_v49  ;;  %v2265_v3 = vld [vmem:[#allocation8 + $0x20] sm:$0xff] }
  0x40   :  { %308 = vmatpush.msrb.mxu0 %v2148_v23  ;;  %329 = vmatpush.msrb.mxu1 %v2158_v26  ;;  %3034 = vst [vmem:[#allocation30_spill] sm:$0xff] %v2226_v50 }
  0x41   :  { %350 = vmatpush.msrb.mxu2 %v2140_v20  ;;  %370 = vmatpush.msrb.mxu3 %v2142_v21  ;;  %3035 = vst [vmem:[#allocation31_spill] sm:$0xff] %v2230_v51 }
  0x42   :  { %309 = vmatpush.msrb.mxu0 %v2160_v27  ;;  %330 = vmatpush.msrb.mxu1 %v2170_v30  ;;  %3036 = vst [vmem:[#allocation32_spill] sm:$0xff] %v2232_v52 }
  0x43   :  { %351 = vmatpush.msrb.mxu2 %v2152_v24  ;;  %371 = vmatpush.msrb.mxu3 %v2154_v25  ;;  %3037 = vst [vmem:[#allocation33_spill] sm:$0xff] %v2236_v53 }
  0x44   :  { %310 = vmatpush.msrb.mxu0 %v2172_v31  ;;  %331 = vmatpush.msrb.mxu1 %v2182_v34  ;;  %3038 = vst [vmem:[#allocation34_spill] sm:$0xff] %v2240_v54 }
  0x45   :  { %352 = vmatpush.msrb.mxu2 %v2164_v28  ;;  %372 = vmatpush.msrb.mxu3 %v2166_v29  ;;  %3039 = vst [vmem:[#allocation35_spill] sm:$0xff] %v2244_v55 }
  0x46   :  { %311 = vmatpush.msrb.mxu0 %v2184_v35  ;;  %332 = vmatpush.msrb.mxu1 %v2194_v38  ;;  %3040 = vst [vmem:[#allocation36_spill] sm:$0xff] %v2246_v56 }
  0x47   :  { %353 = vmatpush.msrb.mxu2 %v2176_v32  ;;  %373 = vmatpush.msrb.mxu3 %v2178_v33  ;;  %3041 = vst [vmem:[#allocation37_spill] sm:$0xff] %v2249_v57 }
  0x48   :  { %211 = vmatmul.f32.vlgmr.msra.gmra.mxu2 %v80_v39  ;;  %231 = vmatmul.f32.vlgmr.msra.gmra.mxu3 %v80_v39  ;;  %3042 = vst [vmem:[#allocation38_spill] sm:$0xff] %v2252_v58 }
  0x49   :  { %354 = vmatpush.msrb.mxu2 %v2188_v36  ;;  %374 = vmatpush.msrb.mxu3 %v2190_v37  ;;  %3043 = vst [vmem:[#allocation39_spill] sm:$0xff] %v2256_v59 }
  0x4a   :  { %312 = vmatpush.msrb.mxu0 %v2204_v42  ;;  %333 = vmatpush.msrb.mxu1 %v2207_v43  ;;  %3044 = vst [vmem:[#allocation40_spill] sm:$0xff] %v2259_v63 }
  0x4b   :  { %355 = vmatpush.msrb.mxu2 %v2198_v40  ;;  %375 = vmatpush.msrb.mxu3 %v2200_v41  ;;  %3045 = vst [vmem:[#allocation41_spill] sm:$0xff] %v2262_v2 }
  0x4c   :  { %313 = vmatpush.msrb.mxu0 %v2215_v46  ;;  %334 = vmatpush.msrb.mxu1 %v2218_v47  ;;  %3046 = vst [vmem:[#allocation42_spill] sm:$0xff] %v2265_v3 }
  0x4d   :  { %356 = vmatpush.msrb.mxu2 %v2209_v44  ;;  %376 = vmatpush.msrb.mxu3 %v2213_v45 }
  0x4e   :  { %314 = vmatpush.msrb.mxu0 %v2226_v50  ;;  %335 = vmatpush.msrb.mxu1 %v2230_v51 }
  0x4f   :  { %357 = vmatpush.msrb.mxu2 %v2220_v48  ;;  %377 = vmatpush.msrb.mxu3 %v2224_v49 }
  0x50   :  { %171 = vmatmul.f32.vlgmr.msra.gmra.mxu0 %v80_v39  ;;  %191 = vmatmul.f32.vlgmr.msra.gmra.mxu1 %v80_v39  ;;  %v2269_v39 = vld [vmem:[#allocation8 + $0x8] sm:$0xff] }
  0x51   :  { %358 = vmatpush.msrb.mxu2 %v2232_v52  ;;  %378 = vmatpush.msrb.mxu3 %v2236_v53  ;;  %3047 = vst [vmem:[#allocation43_spill] sm:$0xff] %v2269_v39 }
  0x52   :  { %315 = vmatpush.msrb.mxu0 %v2240_v54  ;;  %336 = vmatpush.msrb.mxu1 %v2244_v55 }
  0x53   :  { %359 = vmatpush.msrb.mxu2 %v2246_v56  ;;  %379 = vmatpush.msrb.mxu3 %v2249_v57  ;;  %v2273_v57 = vld [vmem:[#allocation8] sm:$0xff] }
  0x54   :  { %360 = vmatmul.f32.vlgmr.msrb.gmra.mxu2 %v2039_v62  ;;  %380 = vmatmul.f32.vlgmr.msrb.gmra.mxu3 %v2039_v62  ;;  %3048 = vst [vmem:[#allocation44_spill] sm:$0xff] %v2273_v57 }
  0x55   :  { %316 = vmatpush.msrb.mxu0 %v2252_v58  ;;  %337 = vmatpush.msrb.mxu1 %v2256_v59 }
  0x56   :  { %511 = vmatpush.msra.mxu2 %v2084_v60  ;;  %531 = vmatpush.msra.mxu3 %v2086_v61 }
  0x57   :  { %317 = vmatpush.msrb.mxu0 %v2259_v63  ;;  %338 = vmatpush.msrb.mxu1 %v2262_v2 }
  0x58   :  { %512 = vmatpush.msra.mxu2 %v2088_v0  ;;  %532 = vmatpush.msra.mxu3 %v2090_v1 }
  0x59   :  { %318 = vmatpush.msrb.mxu0 %v2265_v3  ;;  %339 = vmatpush.msrb.mxu1 %v2269_v39 }
  0x5a   :  { %513 = vmatpush.msra.mxu2 %v2094_v4  ;;  %340 = vmatmul.f32.vlgmr.msrb.gmra.mxu1 %v2039_v62 }
  0x5b   :  { %319 = vmatpush.msrb.mxu0 %v2273_v57  ;;  %491 = vmatpush.msra.mxu1 %v2100_v6 }
  0x5c   :  { %320 = vmatmul.f32.vlgmr.msrb.gmra.mxu0 %v2039_v62  ;;  %533 = vmatpush.msra.mxu3 %v2096_v5  ;;  %v3049_v62 = vld [vmem:[#allocation37_spill] sm:$0xff] }
  0x5d   :  { %471 = vmatpush.msra.mxu0 %v2102_v7  ;;  %492 = vmatpush.msra.mxu1 %v2110_v10 }
  0x5e   :  { %514 = vmatpush.msra.mxu2 %v2104_v8  ;;  %534 = vmatpush.msra.mxu3 %v2106_v9 }
  0x5f   :  { %472 = vmatpush.msra.mxu0 %v2112_v11  ;;  %493 = vmatpush.msra.mxu1 %v2122_v14 }
  0x60   :  { %515 = vmatpush.msra.mxu2 %v2116_v12  ;;  %535 = vmatpush.msra.mxu3 %v2118_v13 }
  0x61   :  { %473 = vmatpush.msra.mxu0 %v2124_v15  ;;  %494 = vmatpush.msra.mxu1 %v2134_v18 }
  0x62   :  { %516 = vmatpush.msra.mxu2 %v2128_v16  ;;  %536 = vmatpush.msra.mxu3 %v2130_v17 }
  0x63   :  { %474 = vmatpush.msra.mxu0 %v2136_v19  ;;  %495 = vmatpush.msra.mxu1 %v2146_v22 }
  0x64   :  { %517 = vmatpush.msra.mxu2 %v2140_v20  ;;  %537 = vmatpush.msra.mxu3 %v2142_v21 }
  0x65   :  { %475 = vmatpush.msra.mxu0 %v2148_v23  ;;  %496 = vmatpush.msra.mxu1 %v2158_v26 }
  0x66   :  { %518 = vmatpush.msra.mxu2 %v2152_v24  ;;  %538 = vmatpush.msra.mxu3 %v2154_v25 }
  0x67   :  { %476 = vmatpush.msra.mxu0 %v2160_v27  ;;  %497 = vmatpush.msra.mxu1 %v2170_v30 }
  0x68   :  { %519 = vmatpush.msra.mxu2 %v2164_v28  ;;  %539 = vmatpush.msra.mxu3 %v2166_v29 }
  0x69   :  { %477 = vmatpush.msra.mxu0 %v2172_v31  ;;  %498 = vmatpush.msra.mxu1 %v2182_v34 }
  0x6a   :  { %520 = vmatpush.msra.mxu2 %v2176_v32  ;;  %540 = vmatpush.msra.mxu3 %v2178_v33 }
  0x6b   :  { %478 = vmatpush.msra.mxu0 %v2184_v35  ;;  %499 = vmatpush.msra.mxu1 %v2194_v38 }
  0x6c   :  { %521 = vmatpush.msra.mxu2 %v2188_v36  ;;  %541 = vmatpush.msra.mxu3 %v2190_v37 }
  0x6d   :  { %479 = vmatpush.msra.mxu0 %v2204_v42  ;;  %500 = vmatpush.msra.mxu1 %v2207_v43 }
  0x6e   :  { %522 = vmatpush.msra.mxu2 %v2198_v40  ;;  %542 = vmatpush.msra.mxu3 %v2200_v41 }
  0x6f   :  { %480 = vmatpush.msra.mxu0 %v2215_v46  ;;  %501 = vmatpush.msra.mxu1 %v2218_v47 }
  0x70   :  { %523 = vmatpush.msra.mxu2 %v2209_v44  ;;  %543 = vmatpush.msra.mxu3 %v2213_v45 }
  0x71   :  { %481 = vmatpush.msra.mxu0 %v2226_v50  ;;  %502 = vmatpush.msra.mxu1 %v2230_v51 }
  0x72   :  { %524 = vmatpush.msra.mxu2 %v2220_v48  ;;  %544 = vmatpush.msra.mxu3 %v2224_v49 }
  0x73   :  { %482 = vmatpush.msra.mxu0 %v2240_v54  ;;  %503 = vmatpush.msra.mxu1 %v2244_v55 }
  0x74   :  { %525 = vmatpush.msra.mxu2 %v2232_v52  ;;  %545 = vmatpush.msra.mxu3 %v2236_v53 }
  0x75   :  { %483 = vmatpush.msra.mxu0 %v2252_v58  ;;  %504 = vmatpush.msra.mxu1 %v2256_v59 }
  0x76   :  { %526 = vmatpush.msra.mxu2 %v2246_v56  ;;  %546 = vmatpush.msra.mxu3 %v3049_v62 }
  0x77   :  { %484 = vmatpush.msra.mxu0 %v2259_v63  ;;  %505 = vmatpush.msra.mxu1 %v2262_v2 }
  0x78   :  { %675 = vmatpush.msrb.mxu2 %v2084_v60  ;;  %695 = vmatpush.msrb.mxu3 %v2086_v61 }
  0x79   :  { %485 = vmatpush.msra.mxu0 %v2265_v3  ;;  %506 = vmatpush.msra.mxu1 %v2269_v39 }
  0x7a   :  { %676 = vmatpush.msrb.mxu2 %v2088_v0  ;;  %696 = vmatpush.msrb.mxu3 %v2090_v1 }
  0x7b   :  { %486 = vmatpush.msra.mxu0 %v2273_v57  ;;  %655 = vmatpush.msrb.mxu1 %v2100_v6 }
  0x7c   :  { %677 = vmatpush.msrb.mxu2 %v2094_v4  ;;  %697 = vmatpush.msrb.mxu3 %v2096_v5 }
  0x7d   :  { %635 = vmatpush.msrb.mxu0 %v2102_v7  ;;  %656 = vmatpush.msrb.mxu1 %v2110_v10 }
  0x7e   :  { %678 = vmatpush.msrb.mxu2 %v2104_v8  ;;  %698 = vmatpush.msrb.mxu3 %v2106_v9 }
  0x7f   :  { %636 = vmatpush.msrb.mxu0 %v2112_v11  ;;  %657 = vmatpush.msrb.mxu1 %v2122_v14 }
  0x80   :  { %679 = vmatpush.msrb.mxu2 %v2116_v12  ;;  %699 = vmatpush.msrb.mxu3 %v2118_v13 }
  0x81   :  { %637 = vmatpush.msrb.mxu0 %v2124_v15  ;;  %658 = vmatpush.msrb.mxu1 %v2134_v18 }
  0x82   :  { %680 = vmatpush.msrb.mxu2 %v2128_v16  ;;  %700 = vmatpush.msrb.mxu3 %v2130_v17 }
  0x83   :  { %638 = vmatpush.msrb.mxu0 %v2136_v19  ;;  %659 = vmatpush.msrb.mxu1 %v2146_v22 }
  0x84   :  { %681 = vmatpush.msrb.mxu2 %v2140_v20  ;;  %701 = vmatpush.msrb.mxu3 %v2142_v21 }
  0x85   :  { %639 = vmatpush.msrb.mxu0 %v2148_v23  ;;  %660 = vmatpush.msrb.mxu1 %v2158_v26 }
  0x86   :  { %682 = vmatpush.msrb.mxu2 %v2152_v24  ;;  %702 = vmatpush.msrb.mxu3 %v2154_v25 }
  0x87   :  { %640 = vmatpush.msrb.mxu0 %v2160_v27  ;;  %661 = vmatpush.msrb.mxu1 %v2170_v30 }
  0x88   :  { %683 = vmatpush.msrb.mxu2 %v2164_v28  ;;  %703 = vmatpush.msrb.mxu3 %v2166_v29 }
  0x89   :  { %641 = vmatpush.msrb.mxu0 %v2172_v31  ;;  %662 = vmatpush.msrb.mxu1 %v2182_v34 }
  0x8a   :  { %684 = vmatpush.msrb.mxu2 %v2176_v32  ;;  %704 = vmatpush.msrb.mxu3 %v2178_v33 }
  0x8b   :  { %642 = vmatpush.msrb.mxu0 %v2184_v35  ;;  %663 = vmatpush.msrb.mxu1 %v2194_v38 }
  0x8c   :  { %685 = vmatpush.msrb.mxu2 %v2188_v36  ;;  %705 = vmatpush.msrb.mxu3 %v2190_v37 }
  0x8d   :  { %643 = vmatpush.msrb.mxu0 %v2204_v42  ;;  %664 = vmatpush.msrb.mxu1 %v2207_v43 }
  0x8e   :  { %686 = vmatpush.msrb.mxu2 %v2198_v40  ;;  %706 = vmatpush.msrb.mxu3 %v2200_v41 }
  0x8f   :  { %644 = vmatpush.msrb.mxu0 %v2215_v46  ;;  %665 = vmatpush.msrb.mxu1 %v2218_v47 }
  0x90   :  { %687 = vmatpush.msrb.mxu2 %v2209_v44  ;;  %707 = vmatpush.msrb.mxu3 %v2213_v45 }
  0x91   :  { %645 = vmatpush.msrb.mxu0 %v2226_v50  ;;  %666 = vmatpush.msrb.mxu1 %v2230_v51 }
  0x92   :  { %688 = vmatpush.msrb.mxu2 %v2220_v48  ;;  %708 = vmatpush.msrb.mxu3 %v2224_v49  ;;  %v145_v49 = vld [vmem:[#allocation9] sm:$0xf] }
  0x93   :  { %646 = vmatpush.msrb.mxu0 %v2240_v54  ;;  %667 = vmatpush.msrb.mxu1 %v2244_v55  ;;  %v149_v48 = vperm.slane %v145_v49, 2  ;;  %v148_v45 = vperm.slane %v145_v49, 1 }
  0x94   :  { %689 = vmatpush.msrb.mxu2 %v2232_v52  ;;  %709 = vmatpush.msrb.mxu3 %v2236_v53  ;;  %v150_v52 = vperm.slane %v145_v49, 3 }
  0x95   :  { %647 = vmatpush.msrb.mxu0 %v2252_v58  ;;  %668 = vmatpush.msrb.mxu1 %v2256_v59  ;;  %v147_v59 = vperm.slane %v145_v49, 0 }
  0x96   :  { %690 = vmatpush.msrb.mxu2 %v2246_v56  ;;  %710 = vmatpush.msrb.mxu3 %v3049_v62 }
  0x97   :  { %648 = vmatpush.msrb.mxu0 %v2259_v63  ;;  %669 = vmatpush.msrb.mxu1 %v2262_v2 }
  0x99   :  { %649 = vmatpush.msrb.mxu0 %v2265_v3  ;;  %670 = vmatpush.msrb.mxu1 %v2269_v39 }
  0x9b   :  { %650 = vmatpush.msrb.mxu0 %v2273_v57 }
  0xcb   :  { %v212_v63 = vpop.f32.mrf.mxu2  ;;  %v232_v55 = vpop.f32.mrf.mxu3 }
  0xcc   :  { %v213_v44 = vadd.f32 %v212_v63, %v149_v48  ;;  %v233_v56 = vadd.f32 %v232_v55, %v150_v52 }
  0xcd   :  { %v172_v53 = vpop.f32.mrf.mxu0  ;;  %v192_v58 = vpop.f32.mrf.mxu1 }
  0xce   :  { %v173_v2 = vadd.f32 %v172_v53, %v147_v59  ;;  %237 = vst [vmem:[#allocation2 + $0x10] sm:$0xff] %v213_v44  ;;  %v193_v3 = vadd.f32 %v192_v58, %v148_v45 }
  0xcf   :  { %238 = vst [vmem:[#allocation2 + $0x18] sm:$0xff] %v233_v56 }
  0xd0   :  { %235 = vst [vmem:[#allocation2] sm:$0xff] %v173_v2 }
  0xd1   :  { %236 = vst [vmem:[#allocation2 + $0x8] sm:$0xff] %v193_v3 }
  0xd7   :  { %v361_v62 = vpop.f32.mrf.mxu2  ;;  %v341_v39 = vpop.f32.mrf.mxu1 }
  0xd8   :  { %v389_v57 = vrot.slane %v361_v62, 6  ;;  %v381_v41 = vpop.f32.mrf.mxu3  ;;  %v388_v40 = vrot.slane %v341_v39, 7  ;;  %v303_v44 = vld [vmem:[#allocation2] ss:$8 sm:$0xf] }
  0xd9   :  { %v390_v49 = vrot.slane %v381_v41, 5  ;;  %v321_v51 = vpop.f32.mrf.mxu0 }
  0xda   :  { %v392_v53 = vsel %vm391_vm1, %v321_v51, %v388_v40 }
  0xdb   :  { %v394_v48 = vsel %vm393_vm0, %v389_v57, %v390_v49 }
  0xdc   :  { %v396_v45 = vsel %vm395_vm2, %v392_v53, %v394_v48 }
  0xdd   :  { %v398_v52 = vadd.f32 %v396_v45, %v303_v44 }
  0xdf   :  { %v1654_v55 = vmul.f32 -1.442695, %v398_v52  ;;  %v419_v56 = vrot.slane %v398_v52, 1  ;;  %v443_v58 = vrot.slane %v398_v52, 3  ;;  %v440_v48 = vrot.slane %v398_v52, 2 }
  0xe1   :  { %1687 = vpow2.f32 %v1654_v55  ;;  %v1655_v59 = vmul.f32 -1.442695, %v419_v56  ;;  %v1656_v63 = vmul.f32 -1.442695, %v443_v58 }
  0xe3   :  { %1689 = vpow2.f32 %v1655_v59 }
  0xe4   :  { %1691 = vpow2.f32 %v1656_v63 }
  0xe7   :  { %v1688_v2 = vpop.eup %1687 }
  0xe8   :  { %v402_v41 = vadd.f32 1.0, %v1688_v2 }
  0xe9   :  { %v1690_v3 = vpop.eup %1689 }
  0xea   :  { %v1692_v39 = vpop.eup %1691  ;;  %1693 = vrcp.f32 %v402_v41  ;;  %v424_v57 = vadd.f32 1.0, %v1690_v3  ;;  %v414_v55 = vand.u32 2147483648, %v402_v41  ;;  %v412_v63 = vand.u32 2147483647, %v402_v41 }
  0xeb   :  { %v448_v62 = vadd.f32 1.0, %v1692_v39  ;;  %vm408_vm4 = vweird.f32 %v402_v41 }
  0xec   :  { %1695 = vrcp.f32 %v424_v57  ;;  %v436_v2 = vand.u32 2147483648, %v424_v57  ;;  %v434_v54 = vand.u32 2147483647, %v424_v57  ;;  %v415_v37 = vor.u32 1.1754944e-38, %v414_v55 }
  0xed   :  { %1697 = vrcp.f32 %v448_v62  ;;  %vm413_vm7 = vcmp.eq.f32.partialorder %v412_v63, 8.507059e+37  ;;  %vm430_vm8 = vweird.f32 %v424_v57  ;;  %v460_v55 = vand.u32 2147483648, %v448_v62  ;;  %v3069_v63 = vld [vmem:[#allocation41_spill] sm:$0xff] }
  0xee   :  { %1699 = vtanh.f32 %v440_v48  ;;  %vm435_vm10 = vcmp.eq.f32.partialorder %v434_v54, 8.507059e+37  ;;  %vm454_vm12 = vweird.f32 %v448_v62 }
  0xf0   :  { %v1694_v40 = vpop.eup %1693 }
  0xf1   :  { %v404_v51 = vmul.f32 %v1694_v40, %v402_v41  ;;  %vm409_vm3 = vweird.f32 %v1694_v40 }
  0xf2   :  { %v1696_v49 = vpop.eup %1695  ;;  %vm410_vm6 = vmor %vm408_vm4, %vm409_vm3 }
  0xf3   :  { %v1698_v53 = vpop.eup %1697  ;;  %v405_v44 = vsub.f32 1.0, %v404_v51  ;;  %v426_v45 = vmul.f32 %v1696_v49, %v424_v57  ;;  %vm431_vm5 = vweird.f32 %v1696_v49  ;;  %v461_v57 = vor.u32 1.1754944e-38, %v460_v55 }
  0xf4   :  { %v450_v56 = vmul.f32 %v1698_v53, %v448_v62  ;;  %vm432_vm9 = vmor %vm430_vm8, %vm431_vm5  ;;  %v1700_v50 = vpop.eup %1699  ;;  %vm455_vm11 = vweird.f32 %v1698_v53 }
  0xf5   :  { %v427_v58 = vsub.f32 1.0, %v426_v45  ;;  %v406_v59 = vmul.f32 %v1694_v40, %v405_v44  ;;  %v437_v45 = vor.u32 1.1754944e-38, %v436_v2  ;;  %vm456_vm13 = vmor %vm454_vm12, %vm455_vm11  ;;  %v3070_v2 = vld [vmem:[#allocation32_spill] sm:$0xff] }
  0xf6   :  { %v451_v36 = vsub.f32 1.0, %v450_v56 }
  0xf7   :  { %v407_v3 = vadd.f32 %v1694_v40, %v406_v59  ;;  %v428_v39 = vmul.f32 %v1696_v49, %v427_v58 }
  0xf8   :  { %v452_v41 = vmul.f32 %v1698_v53, %v451_v36  ;;  %v3064_v36 = vld [vmem:[#allocation40_spill] sm:$0xff] }
  0xf9   :  { %v411_v52 = vsel %vm410_vm6, %v1694_v40, %v407_v3  ;;  %v429_v51 = vadd.f32 %v1696_v49, %v428_v39  ;;  %v458_v40 = vand.u32 2147483647, %v448_v62  ;;  %v3067_v62 = vld [vmem:[#allocation29_spill] sm:$0xff]  ;;  %v3072_v39 = vld [vmem:[#allocation44_spill] sm:$0xff] }
  0xfa   :  { %v416_v47 = vsel %vm413_vm7, %v415_v37, %v411_v52  ;;  %v453_v32 = vadd.f32 %v1698_v53, %v452_v41  ;;  %v3071_v3 = vld [vmem:[#allocation33_spill] sm:$0xff]  ;;  %v3073_v52 = vld [vmem:[#allocation43_spill] sm:$0xff] }
  0xfb   :  { %v433_v44 = vsel %vm432_vm9, %v1696_v49, %v429_v51  ;;  %v465_v59 = vmul.f32 %v1700_v50, %v416_v47  ;;  %vm459_vm14 = vcmp.eq.f32.partialorder %v458_v40, 8.507059e+37  ;;  %v3065_v47 = vld [vmem:[#allocation39_spill] sm:$0xff]  ;;  %v3066_v50 = vld [vmem:[#allocation28_spill] sm:$0xff] }
  0xfc   :  { %v438_v48 = vsel %vm435_vm10, %v437_v45, %v433_v44  ;;  %v457_v37 = vsel %vm456_vm13, %v1698_v53, %v453_v32  ;;  %v3062_v32 = vld [vmem:[#allocation25_spill] sm:$0xff]  ;;  %v3068_v53 = vld [vmem:[#allocation42_spill] sm:$0xff]  ;;  %v3074_v51 = vld [vmem:[#allocation36_spill] sm:$0xff] }
  0xfd   :  { %v464_v33 = vmul.f32 0.0, %v438_v48  ;;  %v462_v54 = vsel %vm459_vm14, %v461_v57, %v457_v37  ;;  %v3075_v45 = vld [vmem:[#allocation37_spill] sm:$0xff] }
  0xff   :  { %v2407_v58 = vadd.f32 %v465_v59, %v464_v33  ;;  %v3063_v33 = vld [vmem:[#allocation26_spill] sm:$0xff] }
 0x101   :  { %1701 = vtanh.f32 %v2407_v58 }
 0x107   :  { %v1702_v49 = vpop.eup %1701 }
 0x108   :  { %v468_v56 = vmul.f32 %v1702_v49, %v462_v54  ;;  %v470_v54 = vld [vmem:[#allocation2 + $0x1] ss:$8 sm:$0xf] }
 0x10a   :  { %487 = vmatmul.f32.vlgmr.msra.gmra.mxu0 %v468_v56  ;;  %507 = vmatmul.f32.vlgmr.msra.gmra.mxu1 %v468_v56 }
 0x10b   :  { %527 = vmatmul.f32.vlgmr.msra.gmra.mxu2 %v468_v56  ;;  %547 = vmatmul.f32.vlgmr.msra.gmra.mxu3 %v468_v56 }
 0x10c   :  { %799 = vmatpush.msra.mxu0 %v2102_v7  ;;  %819 = vmatpush.msra.mxu1 %v2100_v6 }
 0x10d   :  { %839 = vmatpush.msra.mxu2 %v2084_v60  ;;  %859 = vmatpush.msra.mxu3 %v2086_v61  ;;  %v3050_v60 = vld [vmem:[#allocation19_spill] sm:$0xff]  ;;  %v3051_v61 = vld [vmem:[#allocation20_spill] sm:$0xff] }
 0x10e   :  { %800 = vmatpush.msra.mxu0 %v2112_v11  ;;  %820 = vmatpush.msra.mxu1 %v2110_v10 }
 0x10f   :  { %840 = vmatpush.msra.mxu2 %v2088_v0  ;;  %860 = vmatpush.msra.mxu3 %v2090_v1  ;;  %v3052_v0 = vld [vmem:[#allocation30_spill] sm:$0xff]  ;;  %v3053_v1 = vld [vmem:[#allocation27_spill] sm:$0xff] }
 0x110   :  { %801 = vmatpush.msra.mxu0 %v2124_v15  ;;  %821 = vmatpush.msra.mxu1 %v2122_v14 }
 0x111   :  { %841 = vmatpush.msra.mxu2 %v2094_v4  ;;  %861 = vmatpush.msra.mxu3 %v2096_v5  ;;  %v3054_v4 = vld [vmem:[#allocation21_spill] sm:$0xff]  ;;  %v3055_v5 = vld [vmem:[#allocation22_spill] sm:$0xff] }
 0x112   :  { %802 = vmatpush.msra.mxu0 %v2136_v19  ;;  %822 = vmatpush.msra.mxu1 %v2134_v18 }
 0x113   :  { %842 = vmatpush.msra.mxu2 %v2104_v8  ;;  %862 = vmatpush.msra.mxu3 %v2106_v9  ;;  %v3056_v8 = vld [vmem:[#allocation34_spill] sm:$0xff]  ;;  %v3057_v9 = vld [vmem:[#allocation31_spill] sm:$0xff] }
 0x114   :  { %803 = vmatpush.msra.mxu0 %v2148_v23  ;;  %823 = vmatpush.msra.mxu1 %v2146_v22 }
 0x115   :  { %843 = vmatpush.msra.mxu2 %v2116_v12  ;;  %863 = vmatpush.msra.mxu3 %v2118_v13  ;;  %v3058_v12 = vld [vmem:[#allocation23_spill] sm:$0xff]  ;;  %v3059_v13 = vld [vmem:[#allocation24_spill] sm:$0xff] }
 0x116   :  { %804 = vmatpush.msra.mxu0 %v2160_v27  ;;  %824 = vmatpush.msra.mxu1 %v2158_v26 }
 0x117   :  { %844 = vmatpush.msra.mxu2 %v2128_v16  ;;  %864 = vmatpush.msra.mxu3 %v2130_v17  ;;  %v3060_v16 = vld [vmem:[#allocation38_spill] sm:$0xff]  ;;  %v3061_v17 = vld [vmem:[#allocation35_spill] sm:$0xff] }
 0x118   :  { %805 = vmatpush.msra.mxu0 %v2172_v31  ;;  %825 = vmatpush.msra.mxu1 %v2170_v30 }
 0x119   :  { %845 = vmatpush.msra.mxu2 %v2140_v20  ;;  %865 = vmatpush.msra.mxu3 %v2142_v21 }
 0x11a   :  { %806 = vmatpush.msra.mxu0 %v2184_v35  ;;  %826 = vmatpush.msra.mxu1 %v2182_v34 }
 0x11b   :  { %846 = vmatpush.msra.mxu2 %v2152_v24  ;;  %866 = vmatpush.msra.mxu3 %v2154_v25 }
 0x11c   :  { %807 = vmatpush.msra.mxu0 %v2204_v42  ;;  %827 = vmatpush.msra.mxu1 %v2194_v38 }
 0x11d   :  { %847 = vmatpush.msra.mxu2 %v2164_v28  ;;  %867 = vmatpush.msra.mxu3 %v2166_v29 }
 0x11e   :  { %808 = vmatpush.msra.mxu0 %v2215_v46  ;;  %828 = vmatpush.msra.mxu1 %v2207_v43 }
 0x11f   :  { %848 = vmatpush.msra.mxu2 %v3050_v60  ;;  %868 = vmatpush.msra.mxu3 %v3051_v61 }
 0x120   :  { %809 = vmatpush.msra.mxu0 %v3052_v0  ;;  %829 = vmatpush.msra.mxu1 %v3053_v1 }
 0x121   :  { %849 = vmatpush.msra.mxu2 %v3054_v4  ;;  %869 = vmatpush.msra.mxu3 %v3055_v5 }
 0x122   :  { %810 = vmatpush.msra.mxu0 %v3056_v8  ;;  %830 = vmatpush.msra.mxu1 %v3057_v9 }
 0x123   :  { %850 = vmatpush.msra.mxu2 %v3058_v12  ;;  %870 = vmatpush.msra.mxu3 %v3059_v13 }
 0x124   :  { %811 = vmatpush.msra.mxu0 %v3060_v16  ;;  %831 = vmatpush.msra.mxu1 %v3061_v17 }
 0x125   :  { %851 = vmatpush.msra.mxu2 %v3062_v32  ;;  %871 = vmatpush.msra.mxu3 %v3063_v33 }
 0x126   :  { %812 = vmatpush.msra.mxu0 %v3064_v36  ;;  %832 = vmatpush.msra.mxu1 %v3065_v47 }
 0x127   :  { %852 = vmatpush.msra.mxu2 %v3066_v50  ;;  %872 = vmatpush.msra.mxu3 %v3067_v62 }
 0x128   :  { %813 = vmatpush.msra.mxu0 %v3068_v53  ;;  %833 = vmatpush.msra.mxu1 %v3069_v63 }
 0x129   :  { %853 = vmatpush.msra.mxu2 %v3070_v2  ;;  %873 = vmatpush.msra.mxu3 %v3071_v3 }
 0x12a   :  { %814 = vmatpush.msra.mxu0 %v3072_v39  ;;  %834 = vmatpush.msra.mxu1 %v3073_v52 }
 0x12b   :  { %854 = vmatpush.msra.mxu2 %v3074_v51  ;;  %874 = vmatpush.msra.mxu3 %v3075_v45 }
 0x187   :  { %v508_v44 = vpop.f32.mrf.mxu1  ;;  %v488_v37 = vpop.f32.mrf.mxu0 }
 0x188   :  { %v555_v48 = vrot.slane %v508_v44, 7 }
 0x18a   :  { %v558_v57 = vsel %vm391_vm1, %v488_v37, %v555_v48 }
 0x18e   :  { %v528_v41 = vpop.f32.mrf.mxu2  ;;  %v548_v59 = vpop.f32.mrf.mxu3 }
 0x18f   :  { %v556_v55 = vrot.slane %v528_v41, 6  ;;  %v557_v40 = vrot.slane %v548_v59, 5 }
 0x191   :  { %v559_v49 = vsel %vm393_vm0, %v556_v55, %v557_v40 }
 0x192   :  { %v560_v56 = vsel %vm395_vm2, %v558_v57, %v559_v49 }
 0x193   :  { %v562_v39 = vadd.f32 %v560_v56, %v470_v54 }
 0x195   :  { %v1657_v52 = vmul.f32 -1.442695, %v562_v39  ;;  %v583_v3 = vrot.slane %v562_v39, 1  ;;  %v607_v51 = vrot.slane %v562_v39, 3  ;;  %v604_v49 = vrot.slane %v562_v39, 2 }
 0x197   :  { %1703 = vpow2.f32 %v1657_v52  ;;  %v1658_v45 = vmul.f32 -1.442695, %v583_v3  ;;  %v1659_v2 = vmul.f32 -1.442695, %v607_v51 }
 0x199   :  { %1705 = vpow2.f32 %v1658_v45 }
 0x19a   :  { %1707 = vpow2.f32 %v1659_v2 }
 0x19d   :  { %v1704_v44 = vpop.eup %1703 }
 0x19e   :  { %v566_v41 = vadd.f32 1.0, %v1704_v44 }
 0x19f   :  { %v1706_v59 = vpop.eup %1705 }
 0x1a0   :  { %v1708_v63 = vpop.eup %1707  ;;  %1709 = vrcp.f32 %v566_v41  ;;  %v588_v48 = vadd.f32 1.0, %v1706_v59  ;;  %v578_v3 = vand.u32 2147483648, %v566_v41  ;;  %v576_v2 = vand.u32 2147483647, %v566_v41 }
 0x1a1   :  { %v612_v37 = vadd.f32 1.0, %v1708_v63  ;;  %vm572_vm3 = vweird.f32 %v566_v41 }
 0x1a2   :  { %1711 = vrcp.f32 %v588_v48  ;;  %v600_v53 = vand.u32 2147483648, %v588_v48  ;;  %v598_v62 = vand.u32 2147483647, %v588_v48  ;;  %v579_v50 = vor.u32 1.1754944e-38, %v578_v3 }
 0x1a3   :  { %1713 = vrcp.f32 %v612_v37  ;;  %vm577_vm6 = vcmp.eq.f32.partialorder %v576_v2, 8.507059e+37  ;;  %vm594_vm7 = vweird.f32 %v588_v48  ;;  %v624_v3 = vand.u32 2147483648, %v612_v37 }
 0x1a4   :  { %1715 = vtanh.f32 %v604_v49  ;;  %vm599_vm9 = vcmp.eq.f32.partialorder %v598_v62, 8.507059e+37  ;;  %vm618_vm11 = vweird.f32 %v612_v37 }
 0x1a6   :  { %v1710_v55 = vpop.eup %1709 }
 0x1a7   :  { %v568_v40 = vmul.f32 %v1710_v55, %v566_v41  ;;  %vm573_vm15 = vweird.f32 %v1710_v55 }
 0x1a8   :  { %v1712_v57 = vpop.eup %1711  ;;  %vm574_vm5 = vmor %vm572_vm3, %vm573_vm15 }
 0x1a9   :  { %v1714_v54 = vpop.eup %1713  ;;  %v569_v56 = vsub.f32 1.0, %v568_v40  ;;  %v590_v52 = vmul.f32 %v1712_v57, %v588_v48  ;;  %vm595_vm4 = vweird.f32 %v1712_v57  ;;  %v622_v48 = vand.u32 2147483647, %v612_v37 }
 0x1aa   :  { %v614_v51 = vmul.f32 %v1714_v54, %v612_v37  ;;  %vm596_vm8 = vmor %vm594_vm7, %vm595_vm4  ;;  %vm619_vm10 = vweird.f32 %v1714_v54 }
 0x1ab   :  { %v570_v45 = vmul.f32 %v1710_v55, %v569_v56  ;;  %v591_v44 = vsub.f32 1.0, %v590_v52  ;;  %v601_v56 = vor.u32 1.1754944e-38, %v600_v53  ;;  %v1716_v52 = vpop.eup %1715  ;;  %vm620_vm12 = vmor %vm618_vm11, %vm619_vm10  ;;  %v625_v53 = vor.u32 1.1754944e-38, %v624_v3 }
 0x1ac   :  { %v615_v47 = vsub.f32 1.0, %v614_v51  ;;  %vm623_vm13 = vcmp.eq.f32.partialorder %v622_v48, 8.507059e+37 }
 0x1ad   :  { %v571_v59 = vadd.f32 %v1710_v55, %v570_v45  ;;  %v592_v63 = vmul.f32 %v1712_v57, %v591_v44 }
 0x1ae   :  { %v616_v41 = vmul.f32 %v1714_v54, %v615_v47  ;;  %v2494_v47 = vld [vmem:[#allocation8 + $0x1d8] sm:$0xff] }
 0x1af   :  { %v575_v39 = vsel %vm574_vm5, %v1710_v55, %v571_v59  ;;  %v593_v40 = vadd.f32 %v1712_v57, %v592_v63 }
 0x1b0   :  { %v580_v36 = vsel %vm577_vm6, %v579_v50, %v575_v39  ;;  %v617_v17 = vadd.f32 %v1714_v54, %v616_v41 }
 0x1b1   :  { %v597_v33 = vsel %vm596_vm8, %v1712_v57, %v593_v40  ;;  %v629_v44 = vmul.f32 %v1716_v52, %v580_v36  ;;  %v2486_v36 = vld [vmem:[#allocation8 + $0x1f8] sm:$0xff] }
 0x1b2   :  { %v602_v49 = vsel %vm599_vm9, %v601_v56, %v597_v33  ;;  %v621_v50 = vsel %vm620_vm12, %v1714_v54, %v617_v17  ;;  %v2491_v17 = vld [vmem:[#allocation8 + $0x1d0] sm:$0xff] }
 0x1b3   :  { %v628_v45 = vmul.f32 %v602_v49, %v2407_v58  ;;  %v626_v55 = vsel %vm623_vm13, %v625_v53, %v621_v50  ;;  %v2483_v58 = vld [vmem:[#allocation8 + $0x1f0] sm:$0xff] }
 0x1b5   :  { %v2478_v32 = vadd.f32 %v629_v44, %v628_v45 }
 0x1b7   :  { %1717 = vtanh.f32 %v2478_v32 }
 0x1bd   :  { %v1718_v62 = vpop.eup %1717 }
 0x1be   :  { %v632_v33 = vmul.f32 %v1718_v62, %v626_v55 }
 0x1c0   :  { %651 = vmatmul.f32.vlgmr.msrb.gmra.mxu0 %v632_v33  ;;  %671 = vmatmul.f32.vlgmr.msrb.gmra.mxu1 %v632_v33 }
 0x1c1   :  { %691 = vmatmul.f32.vlgmr.msrb.gmra.mxu2 %v632_v33  ;;  %711 = vmatmul.f32.vlgmr.msrb.gmra.mxu3 %v632_v33 }
 0x1c2   :  { %963 = vmatpush.msrb.mxu0 %v2102_v7  ;;  %983 = vmatpush.msrb.mxu1 %v2100_v6  ;;  %v2499_v6 = vld [vmem:[#allocation8 + $0x1b0] sm:$0xff]  ;;  %v2502_v7 = vld [vmem:[#allocation8 + $0x1b8] sm:$0xff] }
 0x1c3   :  { %1003 = vmatpush.msrb.mxu2 %v2483_v58  ;;  %1023 = vmatpush.msrb.mxu3 %v2486_v36 }
 0x1c4   :  { %964 = vmatpush.msrb.mxu0 %v2112_v11  ;;  %984 = vmatpush.msrb.mxu1 %v2110_v10  ;;  %v2507_v10 = vld [vmem:[#allocation8 + $0x190] sm:$0xff]  ;;  %v2510_v11 = vld [vmem:[#allocation8 + $0x198] sm:$0xff] }
 0x1c5   :  { %1004 = vmatpush.msrb.mxu2 %v2491_v17  ;;  %1024 = vmatpush.msrb.mxu3 %v2494_v47 }
 0x1c6   :  { %965 = vmatpush.msrb.mxu0 %v2124_v15  ;;  %985 = vmatpush.msrb.mxu1 %v2122_v14  ;;  %v2515_v14 = vld [vmem:[#allocation8 + $0x170] sm:$0xff]  ;;  %v2518_v15 = vld [vmem:[#allocation8 + $0x178] sm:$0xff] }
 0x1c7   :  { %1005 = vmatpush.msrb.mxu2 %v2499_v6  ;;  %1025 = vmatpush.msrb.mxu3 %v2502_v7 }
 0x1c8   :  { %966 = vmatpush.msrb.mxu0 %v2136_v19  ;;  %986 = vmatpush.msrb.mxu1 %v2134_v18  ;;  %v2523_v18 = vld [vmem:[#allocation8 + $0x150] sm:$0xff]  ;;  %v2526_v19 = vld [vmem:[#allocation8 + $0x158] sm:$0xff] }
 0x1c9   :  { %1006 = vmatpush.msrb.mxu2 %v2507_v10  ;;  %1026 = vmatpush.msrb.mxu3 %v2510_v11 }
 0x1ca   :  { %967 = vmatpush.msrb.mxu0 %v2148_v23  ;;  %987 = vmatpush.msrb.mxu1 %v2146_v22  ;;  %v3078_v22 = vld [vmem:[#allocation26_spill] sm:$0xff]  ;;  %v3079_v23 = vld [vmem:[#allocation40_spill] sm:$0xff] }
 0x1cb   :  { %1007 = vmatpush.msrb.mxu2 %v2515_v14  ;;  %1027 = vmatpush.msrb.mxu3 %v2518_v15 }
 0x1cc   :  { %968 = vmatpush.msrb.mxu0 %v2160_v27  ;;  %988 = vmatpush.msrb.mxu1 %v2158_v26  ;;  %v3082_v26 = vld [vmem:[#allocation29_spill] sm:$0xff]  ;;  %v3083_v27 = vld [vmem:[#allocation42_spill] sm:$0xff] }
 0x1cd   :  { %1008 = vmatpush.msrb.mxu2 %v2523_v18  ;;  %1028 = vmatpush.msrb.mxu3 %v2526_v19 }
 0x1ce   :  { %969 = vmatpush.msrb.mxu0 %v2172_v31  ;;  %989 = vmatpush.msrb.mxu1 %v2170_v30  ;;  %v3086_v30 = vld [vmem:[#allocation33_spill] sm:$0xff]  ;;  %v3087_v31 = vld [vmem:[#allocation44_spill] sm:$0xff] }
 0x1cf   :  { %1009 = vmatpush.msrb.mxu2 %v2140_v20  ;;  %1029 = vmatpush.msrb.mxu3 %v2142_v21  ;;  %v3076_v20 = vld [vmem:[#allocation35_spill] sm:$0xff]  ;;  %v3077_v21 = vld [vmem:[#allocation25_spill] sm:$0xff] }
 0x1d0   :  { %970 = vmatpush.msrb.mxu0 %v2184_v35  ;;  %990 = vmatpush.msrb.mxu1 %v2182_v34  ;;  %v3088_v34 = vld [vmem:[#allocation43_spill] sm:$0xff]  ;;  %v3089_v35 = vld [vmem:[#allocation36_spill] sm:$0xff] }
 0x1d1   :  { %1010 = vmatpush.msrb.mxu2 %v2152_v24  ;;  %1030 = vmatpush.msrb.mxu3 %v2154_v25  ;;  %v3080_v24 = vld [vmem:[#allocation39_spill] sm:$0xff]  ;;  %v3081_v25 = vld [vmem:[#allocation28_spill] sm:$0xff] }
 0x1d2   :  { %971 = vmatpush.msrb.mxu0 %v2204_v42  ;;  %991 = vmatpush.msrb.mxu1 %v2194_v38  ;;  %v3090_v38 = vld [vmem:[#allocation37_spill] sm:$0xff] }
 0x1d3   :  { %1011 = vmatpush.msrb.mxu2 %v2164_v28  ;;  %1031 = vmatpush.msrb.mxu3 %v2166_v29  ;;  %v3084_v28 = vld [vmem:[#allocation41_spill] sm:$0xff]  ;;  %v3085_v29 = vld [vmem:[#allocation32_spill] sm:$0xff] }
 0x1d4   :  { %972 = vmatpush.msrb.mxu0 %v2215_v46  ;;  %992 = vmatpush.msrb.mxu1 %v2207_v43 }
 0x1d5   :  { %1012 = vmatpush.msrb.mxu2 %v3050_v60  ;;  %1032 = vmatpush.msrb.mxu3 %v3051_v61 }
 0x1d6   :  { %973 = vmatpush.msrb.mxu0 %v3052_v0  ;;  %993 = vmatpush.msrb.mxu1 %v3053_v1 }
 0x1d7   :  { %1013 = vmatpush.msrb.mxu2 %v3054_v4  ;;  %1033 = vmatpush.msrb.mxu3 %v3055_v5 }
 0x1d8   :  { %974 = vmatpush.msrb.mxu0 %v3056_v8  ;;  %994 = vmatpush.msrb.mxu1 %v3057_v9  ;;  %v634_v8 = vld [vmem:[#allocation2 + $0x2] ss:$8 sm:$0xf] }
 0x1d9   :  { %1014 = vmatpush.msrb.mxu2 %v3058_v12  ;;  %1034 = vmatpush.msrb.mxu3 %v3059_v13 }
 0x1da   :  { %975 = vmatpush.msrb.mxu0 %v3060_v16  ;;  %995 = vmatpush.msrb.mxu1 %v3076_v20 }
 0x1db   :  { %1015 = vmatpush.msrb.mxu2 %v3077_v21  ;;  %1035 = vmatpush.msrb.mxu3 %v3078_v22 }
 0x1dc   :  { %976 = vmatpush.msrb.mxu0 %v3079_v23  ;;  %996 = vmatpush.msrb.mxu1 %v3080_v24 }
 0x1dd   :  { %1016 = vmatpush.msrb.mxu2 %v3081_v25  ;;  %1036 = vmatpush.msrb.mxu3 %v3082_v26 }
 0x1de   :  { %977 = vmatpush.msrb.mxu0 %v3083_v27  ;;  %997 = vmatpush.msrb.mxu1 %v3084_v28 }
 0x1df   :  { %1017 = vmatpush.msrb.mxu2 %v3085_v29  ;;  %1037 = vmatpush.msrb.mxu3 %v3086_v30 }
 0x1e0   :  { %978 = vmatpush.msrb.mxu0 %v3087_v31  ;;  %998 = vmatpush.msrb.mxu1 %v3088_v34 }
 0x1e1   :  { %1018 = vmatpush.msrb.mxu2 %v3089_v35  ;;  %1038 = vmatpush.msrb.mxu3 %v3090_v38 }
 0x23d   :  { %v672_v42 = vpop.f32.mrf.mxu1  ;;  %v652_v1 = vpop.f32.mrf.mxu0 }
 0x23e   :  { %v719_v43 = vrot.slane %v672_v42, 7 }
 0x240   :  { %v722_v4 = vsel %vm391_vm1, %v652_v1, %v719_v43 }
 0x244   :  { %v692_v46 = vpop.f32.mrf.mxu2  ;;  %v712_v60 = vpop.f32.mrf.mxu3 }
 0x245   :  { %v720_v61 = vrot.slane %v692_v46, 6  ;;  %v721_v0 = vrot.slane %v712_v60, 5 }
 0x247   :  { %v723_v5 = vsel %vm393_vm0, %v720_v61, %v721_v0 }
 0x248   :  { %v724_v9 = vsel %vm395_vm2, %v722_v4, %v723_v5 }
 0x249   :  { %v726_v12 = vadd.f32 %v724_v9, %v634_v8  ;;  %v2579_v8 = vld [vmem:[#allocation8 + $0x1e8] sm:$0xff]  ;;  %v2584_v9 = vld [vmem:[#allocation8 + $0x1c0] sm:$0xff] }
 0x24b   :  { %v1660_v13 = vmul.f32 -1.442695, %v726_v12  ;;  %v747_v16 = vrot.slane %v726_v12, 1  ;;  %v771_v37 = vrot.slane %v726_v12, 3  ;;  %v768_v41 = vrot.slane %v726_v12, 2  ;;  %v2587_v12 = vld [vmem:[#allocation8 + $0x1c8] sm:$0xff] }
 0x24d   :  { %1719 = vpow2.f32 %v1660_v13  ;;  %v1661_v57 = vmul.f32 -1.442695, %v747_v16  ;;  %v1662_v54 = vmul.f32 -1.442695, %v771_v37  ;;  %v2592_v13 = vld [vmem:[#allocation8 + $0x1a0] sm:$0xff]  ;;  %v2595_v16 = vld [vmem:[#allocation8 + $0x1a8] sm:$0xff] }
 0x24e   :  { %v2600_v37 = vld [vmem:[#allocation8 + $0x180] sm:$0xff] }
 0x24f   :  { %1721 = vpow2.f32 %v1661_v57  ;;  %v2603_v57 = vld [vmem:[#allocation8 + $0x188] sm:$0xff] }
 0x250   :  { %1723 = vpow2.f32 %v1662_v54  ;;  %v2608_v54 = vld [vmem:[#allocation8 + $0x160] sm:$0xff] }
 0x253   :  { %v1720_v51 = vpop.eup %1719 }
 0x254   :  { %v730_v2 = vadd.f32 1.0, %v1720_v51  ;;  %v2611_v51 = vld [vmem:[#allocation8 + $0x168] sm:$0xff] }
 0x255   :  { %v1722_v59 = vpop.eup %1721 }
 0x256   :  { %v1724_v63 = vpop.eup %1723  ;;  %1725 = vrcp.f32 %v730_v2  ;;  %v752_v39 = vadd.f32 1.0, %v1722_v59  ;;  %v742_v48 = vand.u32 2147483648, %v730_v2  ;;  %v740_v62 = vand.u32 2147483647, %v730_v2  ;;  %v2619_v59 = vld [vmem:[#allocation8 + $0x148] sm:$0xff] }
 0x257   :  { %v776_v40 = vadd.f32 1.0, %v1724_v63  ;;  %vm736_vm15 = vweird.f32 %v730_v2  ;;  %v2624_v63 = vld [vmem:[#allocation8 + $0x120] sm:$0xff] }
 0x258   :  { %1727 = vrcp.f32 %v752_v39  ;;  %v764_v33 = vand.u32 2147483648, %v752_v39  ;;  %v762_v22 = vand.u32 2147483647, %v752_v39  ;;  %v743_v23 = vor.u32 1.1754944e-38, %v742_v48  ;;  %v2654_v48 = vld [vmem:[#allocation8 + $0xf0] sm:$0xff] }
 0x259   :  { %1729 = vrcp.f32 %v776_v40  ;;  %vm741_vm5 = vcmp.eq.f32.partialorder %v740_v62, 8.507059e+37  ;;  %vm758_vm6 = vweird.f32 %v752_v39  ;;  %v788_v46 = vand.u32 2147483648, %v776_v40  ;;  %v2663_v62 = vld [vmem:[#allocation8 + $0xc8] sm:$0xff] }
 0x25a   :  { %1731 = vtanh.f32 %v768_v41  ;;  %v765_v28 = vor.u32 1.1754944e-38, %v764_v33  ;;  %vm763_vm8 = vcmp.eq.f32.partialorder %v762_v22, 8.507059e+37  ;;  %vm782_vm10 = vweird.f32 %v776_v40  ;;  %v2642_v41 = vld [vmem:[#allocation8 + $0x110] sm:$0xff]  ;;  %3091 = vst [vmem:[#allocation19_spill] sm:$0xff] %v2663_v62  ;;  %v2669_v33 = vld [vmem:[#allocation8 + $0xd8] sm:$0xff] }
 0x25b   :  { %v786_v60 = vand.u32 2147483647, %v776_v40  ;;  %v789_v0 = vor.u32 1.1754944e-38, %v788_v46  ;;  %3093 = vst [vmem:[#allocation30_spill] sm:$0xff] %v2669_v33  ;;  %v2678_v22 = vld [vmem:[#allocation8 + $0xb0] sm:$0xff]  ;;  %v2720_v46 = vld [vmem:[#allocation8 + $0x20] sm:$0xff] }
 0x25c   :  { %v1726_v56 = vpop.eup %1725  ;;  %3096 = vst [vmem:[#allocation22_spill] sm:$0xff] %v2678_v22 }
 0x25d   :  { %v732_v52 = vmul.f32 %v1726_v56, %v730_v2  ;;  %vm737_vm14 = vweird.f32 %v1726_v56  ;;  %vm787_vm12 = vcmp.eq.f32.partialorder %v786_v60, 8.507059e+37  ;;  %v2616_v2 = vld [vmem:[#allocation8 + $0x140] sm:$0xff]  ;;  %3110 = vst [vmem:[#allocation41_spill] sm:$0xff] %v2720_v46  ;;  %v2723_v60 = vld [vmem:[#allocation8 + $0x28] sm:$0xff] }
 0x25e   :  { %v1728_v49 = vpop.eup %1727  ;;  %vm738_vm4 = vmor %vm736_vm15, %vm737_vm14  ;;  %3111 = vst [vmem:[#allocation32_spill] sm:$0xff] %v2723_v60 }
 0x25f   :  { %v1730_v45 = vpop.eup %1729  ;;  %v733_v44 = vsub.f32 1.0, %v732_v52  ;;  %v754_v3 = vmul.f32 %v1728_v49, %v752_v39  ;;  %vm759_vm3 = vweird.f32 %v1728_v49  ;;  %v2627_v39 = vld [vmem:[#allocation8 + $0x128] sm:$0xff]  ;;  %v2636_v52 = vld [vmem:[#allocation8 + $0x100] sm:$0xff] }
 0x260   :  { %v778_v50 = vmul.f32 %v1730_v45, %v776_v40  ;;  %vm760_vm7 = vmor %vm758_vm6, %vm759_vm3  ;;  %v1732_v30 = vpop.eup %1731  ;;  %vm783_vm9 = vweird.f32 %v1730_v45  ;;  %v2630_v40 = vld [vmem:[#allocation8 + $0x130] sm:$0xff] }
 0x261   :  { %v734_v53 = vmul.f32 %v1726_v56, %v733_v44  ;;  %v755_v55 = vsub.f32 1.0, %v754_v3  ;;  %vm784_vm11 = vmor %vm782_vm10, %vm783_vm9  ;;  %v2648_v44 = vld [vmem:[#allocation8 + $0xe0] sm:$0xff]  ;;  %v2651_v3 = vld [vmem:[#allocation8 + $0xe8] sm:$0xff] }
 0x262   :  { %v779_v24 = vsub.f32 1.0, %v778_v50  ;;  %v2657_v50 = vld [vmem:[#allocation8 + $0xf8] sm:$0xff] }
 0x263   :  { %v735_v20 = vadd.f32 %v1726_v56, %v734_v53  ;;  %v756_v21 = vmul.f32 %v1728_v49, %v755_v55  ;;  %v2660_v53 = vld [vmem:[#allocation8 + $0xc0] sm:$0xff]  ;;  %v2666_v55 = vld [vmem:[#allocation8 + $0xd0] sm:$0xff] }
 0x264   :  { %v780_v34 = vmul.f32 %v1730_v45, %v779_v24  ;;  %3092 = vst [vmem:[#allocation20_spill] sm:$0xff] %v2666_v55  ;;  %v2684_v24 = vld [vmem:[#allocation8 + $0x80] sm:$0xff] }
 0x265   :  { %v739_v25 = vsel %vm738_vm4, %v1726_v56, %v735_v20  ;;  %v757_v26 = vadd.f32 %v1728_v49, %v756_v21  ;;  %v2633_v56 = vld [vmem:[#allocation8 + $0x138] sm:$0xff]  ;;  %v2672_v20 = vld [vmem:[#allocation8 + $0xa0] sm:$0xff]  ;;  %v2675_v21 = vld [vmem:[#allocation8 + $0xa8] sm:$0xff]  ;;  %3098 = vst [vmem:[#allocation31_spill] sm:$0xff] %v2684_v24 }
 0x266   :  { %v744_v27 = vsel %vm741_vm5, %v743_v23, %v739_v25  ;;  %v781_v43 = vadd.f32 %v1730_v45, %v780_v34  ;;  %3094 = vst [vmem:[#allocation27_spill] sm:$0xff] %v2672_v20  ;;  %v2681_v23 = vld [vmem:[#allocation8 + $0xb8] sm:$0xff]  ;;  %v2687_v25 = vld [vmem:[#allocation8 + $0x88] sm:$0xff]  ;;  %v2708_v34 = vld [vmem:[#allocation8 + $0x40] sm:$0xff] }
 0x267   :  { %v761_v29 = vsel %vm760_vm7, %v1728_v49, %v757_v26  ;;  %v793_v38 = vmul.f32 %v1732_v30, %v744_v27  ;;  %v2639_v49 = vld [vmem:[#allocation8 + $0x108] sm:$0xff]  ;;  %3095 = vst [vmem:[#allocation21_spill] sm:$0xff] %v2675_v21  ;;  %v2690_v26 = vld [vmem:[#allocation8 + $0x90] sm:$0xff]  ;;  %v2693_v27 = vld [vmem:[#allocation8 + $0x98] sm:$0xff] }
 0x268   :  { %v766_v31 = vsel %vm763_vm8, %v765_v28, %v761_v29  ;;  %v785_v61 = vsel %vm784_vm11, %v1730_v45, %v781_v43  ;;  %v2645_v45 = vld [vmem:[#allocation8 + $0x118] sm:$0xff]  ;;  %3097 = vst [vmem:[#allocation34_spill] sm:$0xff] %v2681_v23  ;;  %v2696_v28 = vld [vmem:[#allocation8 + $0x60] sm:$0xff]  ;;  %v2699_v29 = vld [vmem:[#allocation8 + $0x68] sm:$0xff] }
 0x269   :  { %v792_v35 = vmul.f32 %v766_v31, %v2478_v32  ;;  %v790_v4 = vsel %vm787_vm12, %v789_v0, %v785_v61  ;;  %v2576_v32 = vld [vmem:[#allocation8 + $0x1e0] sm:$0xff]  ;;  %3099 = vst [vmem:[#allocation23_spill] sm:$0xff] %v2687_v25  ;;  %v2702_v30 = vld [vmem:[#allocation8 + $0x70] sm:$0xff]  ;;  %v2705_v31 = vld [vmem:[#allocation8 + $0x78] sm:$0xff] }
 0x26a   :  { %3100 = vst [vmem:[#allocation24_spill] sm:$0xff] %v2690_v26  ;;  %v2717_v43 = vld [vmem:[#allocation8 + $0x58] sm:$0xff]  ;;  %v2726_v61 = vld [vmem:[#allocation8 + $0x30] sm:$0xff] }
 0x26b   :  { %v2573_v42 = vadd.f32 %v793_v38, %v792_v35  ;;  %3101 = vst [vmem:[#allocation38_spill] sm:$0xff] %v2693_v27  ;;  %v2711_v35 = vld [vmem:[#allocation8 + $0x48] sm:$0xff]  ;;  %v2714_v38 = vld [vmem:[#allocation8 + $0x50] sm:$0xff]  ;;  %v2729_v0 = vld [vmem:[#allocation8 + $0x38] sm:$0xff] }
 0x26c   :  { %3102 = vst [vmem:[#allocation35_spill] sm:$0xff] %v2696_v28 }
 0x26d   :  { %1733 = vtanh.f32 %v2573_v42  ;;  %3103 = vst [vmem:[#allocation25_spill] sm:$0xff] %v2699_v29 }
 0x26e   :  { %3104 = vst [vmem:[#allocation26_spill] sm:$0xff] %v2702_v30 }
 0x26f   :  { %3105 = vst [vmem:[#allocation40_spill] sm:$0xff] %v2705_v31 }
 0x270   :  { %3106 = vst [vmem:[#allocation39_spill] sm:$0xff] %v2708_v34 }
 0x271   :  { %3107 = vst [vmem:[#allocation28_spill] sm:$0xff] %v2711_v35 }
 0x272   :  { %3108 = vst [vmem:[#allocation29_spill] sm:$0xff] %v2714_v38 }
 0x273   :  { %v1734_v1 = vpop.eup %1733  ;;  %3109 = vst [vmem:[#allocation42_spill] sm:$0xff] %v2717_v43 }
 0x274   :  { %v796_v5 = vmul.f32 %v1734_v1, %v790_v4  ;;  %3112 = vst [vmem:[#allocation33_spill] sm:$0xff] %v2726_v61  ;;  %v2732_v1 = vld [vmem:[#allocation8] sm:$0xff]  ;;  %v2735_v4 = vld [vmem:[#allocation8 + $0x8] sm:$0xff] }
 0x275   :  { %3113 = vst [vmem:[#allocation44_spill] sm:$0xff] %v2729_v0 }
 0x276   :  { %815 = vmatmul.f32.vlgmr.msra.gmra.mxu0 %v796_v5  ;;  %835 = vmatmul.f32.vlgmr.msra.gmra.mxu1 %v796_v5  ;;  %3114 = vst [vmem:[#allocation43_spill] sm:$0xff] %v2732_v1 }
 0x277   :  { %855 = vmatmul.f32.vlgmr.msra.gmra.mxu2 %v796_v5  ;;  %875 = vmatmul.f32.vlgmr.msra.gmra.mxu3 %v796_v5  ;;  %3115 = vst [vmem:[#allocation36_spill] sm:$0xff] %v2735_v4  ;;  %v2738_v5 = vld [vmem:[#allocation8 + $0x10] sm:$0xff] }
 0x278   :  { %1127 = vmatpush.msra.mxu0 %v2576_v32  ;;  %1147 = vmatpush.msra.mxu1 %v2579_v8  ;;  %3116 = vst [vmem:[#allocation37_spill] sm:$0xff] %v2738_v5 }
 0x279   :  { %1167 = vmatpush.msra.mxu2 %v2483_v58  ;;  %1187 = vmatpush.msra.mxu3 %v2486_v36 }
 0x27a   :  { %1128 = vmatpush.msra.mxu0 %v2584_v9  ;;  %1148 = vmatpush.msra.mxu1 %v2587_v12 }
 0x27b   :  { %1168 = vmatpush.msra.mxu2 %v2491_v17  ;;  %1188 = vmatpush.msra.mxu3 %v2494_v47 }
 0x27c   :  { %1129 = vmatpush.msra.mxu0 %v2592_v13  ;;  %1149 = vmatpush.msra.mxu1 %v2595_v16 }
 0x27d   :  { %1169 = vmatpush.msra.mxu2 %v2499_v6  ;;  %1189 = vmatpush.msra.mxu3 %v2502_v7 }
 0x27e   :  { %1130 = vmatpush.msra.mxu0 %v2600_v37  ;;  %1150 = vmatpush.msra.mxu1 %v2603_v57 }
 0x27f   :  { %1170 = vmatpush.msra.mxu2 %v2507_v10  ;;  %1190 = vmatpush.msra.mxu3 %v2510_v11 }
 0x280   :  { %1131 = vmatpush.msra.mxu0 %v2608_v54  ;;  %1151 = vmatpush.msra.mxu1 %v2611_v51 }
 0x281   :  { %1171 = vmatpush.msra.mxu2 %v2515_v14  ;;  %1191 = vmatpush.msra.mxu3 %v2518_v15 }
 0x282   :  { %1132 = vmatpush.msra.mxu0 %v2616_v2  ;;  %1152 = vmatpush.msra.mxu1 %v2619_v59 }
 0x283   :  { %1172 = vmatpush.msra.mxu2 %v2523_v18  ;;  %1192 = vmatpush.msra.mxu3 %v2526_v19 }
 0x284   :  { %1133 = vmatpush.msra.mxu0 %v2624_v63  ;;  %1153 = vmatpush.msra.mxu1 %v2627_v39 }
 0x285   :  { %1173 = vmatpush.msra.mxu2 %v2630_v40  ;;  %1193 = vmatpush.msra.mxu3 %v2633_v56 }
 0x286   :  { %1134 = vmatpush.msra.mxu0 %v2636_v52  ;;  %1154 = vmatpush.msra.mxu1 %v2639_v49 }
 0x287   :  { %1174 = vmatpush.msra.mxu2 %v2642_v41  ;;  %1194 = vmatpush.msra.mxu3 %v2645_v45 }
 0x288   :  { %1135 = vmatpush.msra.mxu0 %v2648_v44  ;;  %1155 = vmatpush.msra.mxu1 %v2651_v3 }
 0x289   :  { %1175 = vmatpush.msra.mxu2 %v2654_v48  ;;  %1195 = vmatpush.msra.mxu3 %v2657_v50 }
 0x28a   :  { %1136 = vmatpush.msra.mxu0 %v2660_v53  ;;  %1156 = vmatpush.msra.mxu1 %v2663_v62 }
 0x28b   :  { %1176 = vmatpush.msra.mxu2 %v2666_v55  ;;  %1196 = vmatpush.msra.mxu3 %v2669_v33 }
 0x28c   :  { %1137 = vmatpush.msra.mxu0 %v2672_v20  ;;  %1157 = vmatpush.msra.mxu1 %v2675_v21 }
 0x28d   :  { %1177 = vmatpush.msra.mxu2 %v2678_v22  ;;  %1197 = vmatpush.msra.mxu3 %v2681_v23 }
 0x28e   :  { %1138 = vmatpush.msra.mxu0 %v2684_v24  ;;  %1158 = vmatpush.msra.mxu1 %v2687_v25 }
 0x28f   :  { %1178 = vmatpush.msra.mxu2 %v2690_v26  ;;  %1198 = vmatpush.msra.mxu3 %v2693_v27 }
 0x290   :  { %1139 = vmatpush.msra.mxu0 %v2696_v28  ;;  %1159 = vmatpush.msra.mxu1 %v2699_v29 }
 0x291   :  { %1179 = vmatpush.msra.mxu2 %v2702_v30  ;;  %1199 = vmatpush.msra.mxu3 %v2705_v31 }
 0x292   :  { %1140 = vmatpush.msra.mxu0 %v2708_v34  ;;  %1160 = vmatpush.msra.mxu1 %v2711_v35 }
 0x293   :  { %1180 = vmatpush.msra.mxu2 %v2714_v38  ;;  %1200 = vmatpush.msra.mxu3 %v2717_v43 }
 0x294   :  { %1141 = vmatpush.msra.mxu0 %v2720_v46  ;;  %1161 = vmatpush.msra.mxu1 %v2723_v60  ;;  %v2741_v60 = vld [vmem:[#allocation8 + $0x18] sm:$0xff] }
 0x295   :  { %1181 = vmatpush.msra.mxu2 %v2726_v61  ;;  %1201 = vmatpush.msra.mxu3 %v2729_v0  ;;  %3117 = vst [vmem:[#allocation45_spill] sm:$0xff] %v2741_v60 }
 0x296   :  { %1142 = vmatpush.msra.mxu0 %v2732_v1  ;;  %1162 = vmatpush.msra.mxu1 %v2735_v4  ;;  %v798_v4 = vld [vmem:[#allocation2 + $0x3] ss:$8 sm:$0xf] }
 0x297   :  { %1182 = vmatpush.msra.mxu2 %v2738_v5  ;;  %1202 = vmatpush.msra.mxu3 %v2741_v60 }
 0x2f3   :  { %v836_v61 = vpop.f32.mrf.mxu1  ;;  %v816_v34 = vpop.f32.mrf.mxu0 }
 0x2f4   :  { %v883_v46 = vrot.slane %v836_v61, 7 }
 0x2f6   :  { %v886_v1 = vsel %vm391_vm1, %v816_v34, %v883_v46 }
 0x2fa   :  { %v856_v43 = vpop.f32.mrf.mxu2  ;;  %v876_v0 = vpop.f32.mrf.mxu3 }
 0x2fb   :  { %v884_v38 = vrot.slane %v856_v43, 6  ;;  %v885_v35 = vrot.slane %v876_v0, 5 }
 0x2fd   :  { %v887_v31 = vsel %vm393_vm0, %v884_v38, %v885_v35 }
 0x2fe   :  { %v888_v30 = vsel %vm395_vm2, %v886_v1, %v887_v31 }
 0x2ff   :  { %v890_v29 = vadd.f32 %v888_v30, %v798_v4 }
 0x301   :  { %v1663_v5 = vmul.f32 -1.442695, %v890_v29  ;;  %v911_v28 = vrot.slane %v890_v29, 1  ;;  %v935_v27 = vrot.slane %v890_v29, 3  ;;  %v932_v38 = vrot.slane %v890_v29, 2 }
 0x303   :  { %1735 = vpow2.f32 %v1663_v5  ;;  %v1664_v60 = vmul.f32 -1.442695, %v911_v28  ;;  %v1665_v26 = vmul.f32 -1.442695, %v935_v27 }
 0x305   :  { %1737 = vpow2.f32 %v1664_v60 }
 0x306   :  { %1739 = vpow2.f32 %v1665_v26 }
 0x309   :  { %v1736_v61 = vpop.eup %1735 }
 0x30a   :  { %v894_v43 = vadd.f32 1.0, %v1736_v61 }
 0x30b   :  { %v1738_v0 = vpop.eup %1737 }
 0x30c   :  { %v1740_v25 = vpop.eup %1739  ;;  %1741 = vrcp.f32 %v894_v43  ;;  %v916_v34 = vadd.f32 1.0, %v1738_v0  ;;  %v906_v28 = vand.u32 2147483648, %v894_v43  ;;  %v904_v26 = vand.u32 2147483647, %v894_v43 }
 0x30d   :  { %v940_v46 = vadd.f32 1.0, %v1740_v25  ;;  %vm900_vm14 = vweird.f32 %v894_v43 }
 0x30e   :  { %1743 = vrcp.f32 %v916_v34  ;;  %v928_v24 = vand.u32 2147483648, %v916_v34  ;;  %v926_v23 = vand.u32 2147483647, %v916_v34  ;;  %v907_v22 = vor.u32 1.1754944e-38, %v906_v28 }
 0x30f   :  { %1745 = vrcp.f32 %v940_v46  ;;  %vm905_vm4 = vcmp.eq.f32.partialorder %v904_v26, 8.507059e+37  ;;  %vm922_vm5 = vweird.f32 %v916_v34  ;;  %v952_v28 = vand.u32 2147483648, %v940_v46  ;;  %v3126_v26 = vld [vmem:[#allocation23_spill] sm:$0xff] }
 0x310   :  { %1747 = vtanh.f32 %v932_v38  ;;  %vm927_vm7 = vcmp.eq.f32.partialorder %v926_v23, 8.507059e+37  ;;  %vm946_vm9 = vweird.f32 %v940_v46 }
 0x312   :  { %v1742_v35 = vpop.eup %1741 }
 0x313   :  { %v896_v31 = vmul.f32 %v1742_v35, %v894_v43  ;;  %vm901_vm13 = vweird.f32 %v1742_v35 }
 0x314   :  { %v1744_v30 = vpop.eup %1743  ;;  %vm902_vm3 = vmor %vm900_vm14, %vm901_vm13 }
 0x315   :  { %v1746_v1 = vpop.eup %1745  ;;  %v897_v4 = vsub.f32 1.0, %v896_v31  ;;  %v918_v5 = vmul.f32 %v1744_v30, %v916_v34  ;;  %vm923_vm15 = vweird.f32 %v1744_v30  ;;  %v950_v34 = vand.u32 2147483647, %v940_v46 }
 0x316   :  { %v942_v27 = vmul.f32 %v1746_v1, %v940_v46  ;;  %vm924_vm6 = vmor %vm922_vm5, %vm923_vm15  ;;  %vm947_vm8 = vweird.f32 %v1746_v1  ;;  %v3122_v46 = vld [vmem:[#allocation21_spill] sm:$0xff] }
 0x317   :  { %v898_v60 = vmul.f32 %v1742_v35, %v897_v4  ;;  %v919_v61 = vsub.f32 1.0, %v918_v5  ;;  %v929_v4 = vor.u32 1.1754944e-38, %v928_v24  ;;  %v1748_v5 = vpop.eup %1747  ;;  %vm948_vm10 = vmor %vm946_vm9, %vm947_vm8  ;;  %v953_v24 = vor.u32 1.1754944e-38, %v952_v28  ;;  %v3137_v28 = vld [vmem:[#allocation41_spill] sm:$0xff] }
 0x318   :  { %v943_v21 = vsub.f32 1.0, %v942_v27  ;;  %vm951_vm11 = vcmp.eq.f32.partialorder %v950_v34, 8.507059e+37  ;;  %v3125_v27 = vld [vmem:[#allocation31_spill] sm:$0xff]  ;;  %v3138_v34 = vld [vmem:[#allocation32_spill] sm:$0xff] }
 0x319   :  { %v899_v0 = vadd.f32 %v1742_v35, %v898_v60  ;;  %v920_v25 = vmul.f32 %v1744_v30, %v919_v61 }
 0x31a   :  { %v944_v43 = vmul.f32 %v1746_v1, %v943_v21  ;;  %v3121_v21 = vld [vmem:[#allocation27_spill] sm:$0xff] }
 0x31b   :  { %v903_v29 = vsel %vm902_vm3, %v1742_v35, %v899_v0  ;;  %v921_v31 = vadd.f32 %v1744_v30, %v920_v25  ;;  %v3127_v0 = vld [vmem:[#allocation24_spill] sm:$0xff]  ;;  %v3128_v25 = vld [vmem:[#allocation38_spill] sm:$0xff] }
 0x31c   :  { %v908_v20 = vsel %vm905_vm4, %v907_v22, %v903_v29  ;;  %v945_v62 = vadd.f32 %v1746_v1, %v944_v43  ;;  %v3129_v29 = vld [vmem:[#allocation35_spill] sm:$0xff]  ;;  %v3134_v43 = vld [vmem:[#allocation28_spill] sm:$0xff] }
 0x31d   :  { %v925_v33 = vsel %vm924_vm6, %v1744_v30, %v921_v31  ;;  %v957_v61 = vmul.f32 %v1748_v5, %v908_v20  ;;  %v3120_v20 = vld [vmem:[#allocation30_spill] sm:$0xff]  ;;  %v3130_v31 = vld [vmem:[#allocation25_spill] sm:$0xff]  ;;  %v3132_v5 = vld [vmem:[#allocation40_spill] sm:$0xff] }
 0x31e   :  { %v930_v38 = vsel %vm927_vm7, %v929_v4, %v925_v33  ;;  %v949_v22 = vsel %vm948_vm10, %v1746_v1, %v945_v62  ;;  %v3119_v62 = vld [vmem:[#allocation20_spill] sm:$0xff]  ;;  %v3123_v30 = vld [vmem:[#allocation22_spill] sm:$0xff] }
 0x31f   :  { %v956_v60 = vmul.f32 %v930_v38, %v2573_v42  ;;  %v954_v35 = vsel %vm951_vm11, %v953_v24, %v949_v22  ;;  %v3118_v42 = vld [vmem:[#allocation19_spill] sm:$0xff]  ;;  %v3124_v1 = vld [vmem:[#allocation34_spill] sm:$0xff]  ;;  %v3139_v22 = vld [vmem:[#allocation33_spill] sm:$0xff] }
 0x320   :  { %v3131_v4 = vld [vmem:[#allocation26_spill] sm:$0xff]  ;;  %v3133_v38 = vld [vmem:[#allocation39_spill] sm:$0xff]  ;;  %v3140_v24 = vld [vmem:[#allocation44_spill] sm:$0xff] }
 0x321   :  { %v2748_v55 = vadd.f32 %v957_v61, %v956_v60  ;;  %v3135_v60 = vld [vmem:[#allocation29_spill] sm:$0xff]  ;;  %v3136_v61 = vld [vmem:[#allocation42_spill] sm:$0xff] }
 0x323   :  { %1749 = vtanh.f32 %v2748_v55 }
 0x329   :  { %v1750_v23 = vpop.eup %1749 }
 0x32a   :  { %v960_v33 = vmul.f32 %v1750_v23, %v954_v35  ;;  %v3141_v23 = vld [vmem:[#allocation43_spill] sm:$0xff]  ;;  %v3142_v35 = vld [vmem:[#allocation36_spill] sm:$0xff] }
 0x32c   :  { %979 = vmatmul.f32.vlgmr.msrb.gmra.mxu0 %v960_v33  ;;  %999 = vmatmul.f32.vlgmr.msrb.gmra.mxu1 %v960_v33 }
 0x32d   :  { %1019 = vmatmul.f32.vlgmr.msrb.gmra.mxu2 %v960_v33  ;;  %1039 = vmatmul.f32.vlgmr.msrb.gmra.mxu3 %v960_v33  ;;  %v3143_v33 = vld [vmem:[#allocation37_spill] sm:$0xff] }
 0x32e   :  { %1291 = vmatpush.msrb.mxu0 %v2576_v32  ;;  %1311 = vmatpush.msrb.mxu1 %v2579_v8 }
 0x32f   :  { %1331 = vmatpush.msrb.mxu2 %v2483_v58  ;;  %1351 = vmatpush.msrb.mxu3 %v2486_v36 }
 0x330   :  { %1292 = vmatpush.msrb.mxu0 %v2584_v9  ;;  %1312 = vmatpush.msrb.mxu1 %v2587_v12 }
 0x331   :  { %1332 = vmatpush.msrb.mxu2 %v2491_v17  ;;  %1352 = vmatpush.msrb.mxu3 %v2494_v47 }
 0x332   :  { %1293 = vmatpush.msrb.mxu0 %v2592_v13  ;;  %1313 = vmatpush.msrb.mxu1 %v2595_v16 }
 0x333   :  { %1333 = vmatpush.msrb.mxu2 %v2499_v6  ;;  %1353 = vmatpush.msrb.mxu3 %v2502_v7 }
 0x334   :  { %1294 = vmatpush.msrb.mxu0 %v2600_v37  ;;  %1314 = vmatpush.msrb.mxu1 %v2603_v57 }
 0x335   :  { %1334 = vmatpush.msrb.mxu2 %v2507_v10  ;;  %1354 = vmatpush.msrb.mxu3 %v2510_v11 }
 0x336   :  { %1295 = vmatpush.msrb.mxu0 %v2608_v54  ;;  %1315 = vmatpush.msrb.mxu1 %v2611_v51 }
 0x337   :  { %1335 = vmatpush.msrb.mxu2 %v2515_v14  ;;  %1355 = vmatpush.msrb.mxu3 %v2518_v15 }
 0x338   :  { %1296 = vmatpush.msrb.mxu0 %v2616_v2  ;;  %1316 = vmatpush.msrb.mxu1 %v2619_v59 }
 0x339   :  { %1336 = vmatpush.msrb.mxu2 %v2523_v18  ;;  %1356 = vmatpush.msrb.mxu3 %v2526_v19 }
 0x33a   :  { %1297 = vmatpush.msrb.mxu0 %v2624_v63  ;;  %1317 = vmatpush.msrb.mxu1 %v2627_v39 }
 0x33b   :  { %1337 = vmatpush.msrb.mxu2 %v2630_v40  ;;  %1357 = vmatpush.msrb.mxu3 %v2633_v56 }
 0x33c   :  { %1298 = vmatpush.msrb.mxu0 %v2636_v52  ;;  %1318 = vmatpush.msrb.mxu1 %v2639_v49 }
 0x33d   :  { %1338 = vmatpush.msrb.mxu2 %v2642_v41  ;;  %1358 = vmatpush.msrb.mxu3 %v2645_v45 }
 0x33e   :  { %1299 = vmatpush.msrb.mxu0 %v2648_v44  ;;  %1319 = vmatpush.msrb.mxu1 %v2651_v3 }
 0x33f   :  { %1339 = vmatpush.msrb.mxu2 %v2654_v48  ;;  %1359 = vmatpush.msrb.mxu3 %v2657_v50 }
 0x340   :  { %1300 = vmatpush.msrb.mxu0 %v2660_v53  ;;  %1320 = vmatpush.msrb.mxu1 %v3118_v42 }
 0x341   :  { %1340 = vmatpush.msrb.mxu2 %v3119_v62  ;;  %1360 = vmatpush.msrb.mxu3 %v3120_v20 }
 0x342   :  { %1301 = vmatpush.msrb.mxu0 %v3121_v21  ;;  %1321 = vmatpush.msrb.mxu1 %v3122_v46 }
 0x343   :  { %1341 = vmatpush.msrb.mxu2 %v3123_v30  ;;  %1361 = vmatpush.msrb.mxu3 %v3124_v1 }
 0x344   :  { %1302 = vmatpush.msrb.mxu0 %v3125_v27  ;;  %1322 = vmatpush.msrb.mxu1 %v3126_v26 }
 0x345   :  { %1342 = vmatpush.msrb.mxu2 %v3127_v0  ;;  %1362 = vmatpush.msrb.mxu3 %v3128_v25 }
 0x346   :  { %1303 = vmatpush.msrb.mxu0 %v3129_v29  ;;  %1323 = vmatpush.msrb.mxu1 %v3130_v31 }
 0x347   :  { %1343 = vmatpush.msrb.mxu2 %v3131_v4  ;;  %1363 = vmatpush.msrb.mxu3 %v3132_v5 }
 0x348   :  { %1304 = vmatpush.msrb.mxu0 %v3133_v38  ;;  %1324 = vmatpush.msrb.mxu1 %v3134_v43  ;;  %v3144_v38 = vld [vmem:[#allocation45_spill] sm:$0xff] }
 0x349   :  { %1344 = vmatpush.msrb.mxu2 %v3135_v60  ;;  %1364 = vmatpush.msrb.mxu3 %v3136_v61 }
 0x34a   :  { %1305 = vmatpush.msrb.mxu0 %v3137_v28  ;;  %1325 = vmatpush.msrb.mxu1 %v3138_v34 }
 0x34b   :  { %1345 = vmatpush.msrb.mxu2 %v3139_v22  ;;  %1365 = vmatpush.msrb.mxu3 %v3140_v24  ;;  %v962_v24 = vld [vmem:[#allocation2 + $0x4] ss:$8 sm:$0xf] }
 0x34c   :  { %1306 = vmatpush.msrb.mxu0 %v3141_v23  ;;  %1326 = vmatpush.msrb.mxu1 %v3142_v35 }
 0x34d   :  { %1346 = vmatpush.msrb.mxu2 %v3143_v33  ;;  %1366 = vmatpush.msrb.mxu3 %v3144_v38 }
 0x3a9   :  { %v1000_v43 = vpop.f32.mrf.mxu1  ;;  %v980_v31 = vpop.f32.mrf.mxu0 }
 0x3aa   :  { %v1047_v60 = vrot.slane %v1000_v43, 7 }
 0x3ac   :  { %v1050_v34 = vsel %vm391_vm1, %v980_v31, %v1047_v60 }
 0x3b0   :  { %v1020_v5 = vpop.f32.mrf.mxu2  ;;  %v1040_v61 = vpop.f32.mrf.mxu3 }
 0x3b1   :  { %v1048_v4 = vrot.slane %v1020_v5, 6  ;;  %v1049_v28 = vrot.slane %v1040_v61, 5 }
 0x3b3   :  { %v1051_v22 = vsel %vm393_vm0, %v1048_v4, %v1049_v28 }
 0x3b4   :  { %v1052_v23 = vsel %vm395_vm2, %v1050_v34, %v1051_v22 }
 0x3b5   :  { %v1054_v29 = vadd.f32 %v1052_v23, %v962_v24 }
 0x3b7   :  { %v1666_v35 = vmul.f32 -1.442695, %v1054_v29  ;;  %v1075_v25 = vrot.slane %v1054_v29, 1  ;;  %v1099_v33 = vrot.slane %v1054_v29, 3  ;;  %v1096_v22 = vrot.slane %v1054_v29, 2 }
 0x3b9   :  { %1751 = vpow2.f32 %v1666_v35  ;;  %v1667_v38 = vmul.f32 -1.442695, %v1075_v25  ;;  %v1668_v0 = vmul.f32 -1.442695, %v1099_v33 }
 0x3bb   :  { %1753 = vpow2.f32 %v1667_v38 }
 0x3bc   :  { %1755 = vpow2.f32 %v1668_v0 }
 0x3bf   :  { %v1752_v43 = vpop.eup %1751 }
 0x3c0   :  { %v1058_v5 = vadd.f32 1.0, %v1752_v43 }
 0x3c1   :  { %v1754_v61 = vpop.eup %1753 }
 0x3c2   :  { %v1756_v26 = vpop.eup %1755  ;;  %1757 = vrcp.f32 %v1058_v5  ;;  %v1080_v31 = vadd.f32 1.0, %v1754_v61  ;;  %v1070_v25 = vand.u32 2147483648, %v1058_v5  ;;  %v1068_v0 = vand.u32 2147483647, %v1058_v5 }
 0x3c3   :  { %v1104_v60 = vadd.f32 1.0, %v1756_v26  ;;  %vm1064_vm13 = vweird.f32 %v1058_v5 }
 0x3c4   :  { %1759 = vrcp.f32 %v1080_v31  ;;  %v1092_v27 = vand.u32 2147483648, %v1080_v31  ;;  %v1090_v1 = vand.u32 2147483647, %v1080_v31  ;;  %v1071_v30 = vor.u32 1.1754944e-38, %v1070_v25 }
 0x3c5   :  { %1761 = vrcp.f32 %v1104_v60  ;;  %vm1069_vm3 = vcmp.eq.f32.partialorder %v1068_v0, 8.507059e+37  ;;  %vm1086_vm4 = vweird.f32 %v1080_v31  ;;  %v1116_v25 = vand.u32 2147483648, %v1104_v60 }
 0x3c6   :  { %1763 = vtanh.f32 %v1096_v22  ;;  %vm1091_vm6 = vcmp.eq.f32.partialorder %v1090_v1, 8.507059e+37  ;;  %vm1110_vm8 = vweird.f32 %v1104_v60 }
 0x3c8   :  { %v1758_v4 = vpop.eup %1757 }
 0x3c9   :  { %v1060_v28 = vmul.f32 %v1758_v4, %v1058_v5  ;;  %vm1065_vm12 = vweird.f32 %v1758_v4 }
 0x3ca   :  { %v1760_v34 = vpop.eup %1759  ;;  %vm1066_vm15 = vmor %vm1064_vm13, %vm1065_vm12 }
 0x3cb   :  { %v1762_v24 = vpop.eup %1761  ;;  %v1061_v23 = vsub.f32 1.0, %v1060_v28  ;;  %v1082_v35 = vmul.f32 %v1760_v34, %v1080_v31  ;;  %vm1087_vm14 = vweird.f32 %v1760_v34  ;;  %v1114_v31 = vand.u32 2147483647, %v1104_v60 }
 0x3cc   :  { %v1106_v33 = vmul.f32 %v1762_v24, %v1104_v60  ;;  %vm1088_vm5 = vmor %vm1086_vm4, %vm1087_vm14  ;;  %vm1111_vm7 = vweird.f32 %v1762_v24 }
 0x3cd   :  { %v1062_v38 = vmul.f32 %v1758_v4, %v1061_v23  ;;  %v1083_v43 = vsub.f32 1.0, %v1082_v35  ;;  %v1093_v23 = vor.u32 1.1754944e-38, %v1092_v27  ;;  %v1764_v35 = vpop.eup %1763  ;;  %vm1112_vm9 = vmor %vm1110_vm8, %vm1111_vm7  ;;  %v1117_v27 = vor.u32 1.1754944e-38, %v1116_v25 }
 0x3ce   :  { %v1107_v46 = vsub.f32 1.0, %v1106_v33  ;;  %vm1115_vm10 = vcmp.eq.f32.partialorder %v1114_v31, 8.507059e+37 }
 0x3cf   :  { %v1063_v61 = vadd.f32 %v1758_v4, %v1062_v38  ;;  %v1084_v26 = vmul.f32 %v1760_v34, %v1083_v43 }
 0x3d0   :  { %v1108_v5 = vmul.f32 %v1762_v24, %v1107_v46 }
 0x3d1   :  { %v1067_v29 = vsel %vm1066_vm15, %v1758_v4, %v1063_v61  ;;  %v1085_v28 = vadd.f32 %v1760_v34, %v1084_v26 }
 0x3d2   :  { %v1072_v21 = vsel %vm1069_vm3, %v1071_v30, %v1067_v29  ;;  %v1109_v42 = vadd.f32 %v1762_v24, %v1108_v5 }
 0x3d3   :  { %v1089_v20 = vsel %vm1088_vm5, %v1760_v34, %v1085_v28  ;;  %v1121_v43 = vmul.f32 %v1764_v35, %v1072_v21 }
 0x3d4   :  { %v1094_v22 = vsel %vm1091_vm6, %v1093_v23, %v1089_v20  ;;  %v1113_v30 = vsel %vm1112_vm9, %v1762_v24, %v1109_v42 }
 0x3d5   :  { %v1120_v38 = vmul.f32 %v1094_v22, %v2748_v55  ;;  %v1118_v4 = vsel %vm1115_vm10, %v1117_v27, %v1113_v30 }
 0x3d7   :  { %v2819_v62 = vadd.f32 %v1121_v43, %v1120_v38 }
 0x3d9   :  { %1765 = vtanh.f32 %v2819_v62 }
 0x3df   :  { %v1766_v1 = vpop.eup %1765 }
 0x3e0   :  { %v1124_v20 = vmul.f32 %v1766_v1, %v1118_v4 }
 0x3e2   :  { %1143 = vmatmul.f32.vlgmr.msra.gmra.mxu0 %v1124_v20  ;;  %1163 = vmatmul.f32.vlgmr.msra.gmra.mxu1 %v1124_v20 }
 0x3e3   :  { %1183 = vmatmul.f32.vlgmr.msra.gmra.mxu2 %v1124_v20  ;;  %1203 = vmatmul.f32.vlgmr.msra.gmra.mxu3 %v1124_v20 }
 0x3e4   :  { %1455 = vmatpush.msra.mxu0 %v2576_v32  ;;  %1475 = vmatpush.msra.mxu1 %v2579_v8  ;;  %v3157_v32 = vld [vmem:[#allocation25_spill] sm:$0xff]  ;;  %v3158_v8 = vld [vmem:[#allocation26_spill] sm:$0xff] }
 0x3e5   :  { %1495 = vmatpush.msra.mxu2 %v2483_v58  ;;  %1515 = vmatpush.msra.mxu3 %v2486_v36  ;;  %v3145_v58 = vld [vmem:[#allocation19_spill] sm:$0xff]  ;;  %v3146_v36 = vld [vmem:[#allocation20_spill] sm:$0xff] }
 0x3e6   :  { %1456 = vmatpush.msra.mxu0 %v2584_v9  ;;  %1476 = vmatpush.msra.mxu1 %v2587_v12  ;;  %v3159_v9 = vld [vmem:[#allocation40_spill] sm:$0xff]  ;;  %v3160_v12 = vld [vmem:[#allocation39_spill] sm:$0xff] }
 0x3e7   :  { %1496 = vmatpush.msra.mxu2 %v2491_v17  ;;  %1516 = vmatpush.msra.mxu3 %v2494_v47  ;;  %v3147_v17 = vld [vmem:[#allocation30_spill] sm:$0xff]  ;;  %v3148_v47 = vld [vmem:[#allocation27_spill] sm:$0xff] }
 0x3e8   :  { %1457 = vmatpush.msra.mxu0 %v2592_v13  ;;  %1477 = vmatpush.msra.mxu1 %v2595_v16  ;;  %v3161_v13 = vld [vmem:[#allocation28_spill] sm:$0xff]  ;;  %v3162_v16 = vld [vmem:[#allocation29_spill] sm:$0xff] }
 0x3e9   :  { %1497 = vmatpush.msra.mxu2 %v2499_v6  ;;  %1517 = vmatpush.msra.mxu3 %v2502_v7  ;;  %v3149_v6 = vld [vmem:[#allocation21_spill] sm:$0xff]  ;;  %v3150_v7 = vld [vmem:[#allocation22_spill] sm:$0xff] }
 0x3ea   :  { %1458 = vmatpush.msra.mxu0 %v2600_v37  ;;  %1478 = vmatpush.msra.mxu1 %v2603_v57  ;;  %v3163_v37 = vld [vmem:[#allocation42_spill] sm:$0xff]  ;;  %v3164_v57 = vld [vmem:[#allocation41_spill] sm:$0xff] }
 0x3eb   :  { %1498 = vmatpush.msra.mxu2 %v2507_v10  ;;  %1518 = vmatpush.msra.mxu3 %v2510_v11  ;;  %v3151_v10 = vld [vmem:[#allocation34_spill] sm:$0xff]  ;;  %v3152_v11 = vld [vmem:[#allocation31_spill] sm:$0xff] }
 0x3ec   :  { %1459 = vmatpush.msra.mxu0 %v2608_v54  ;;  %1479 = vmatpush.msra.mxu1 %v2611_v51  ;;  %v3165_v54 = vld [vmem:[#allocation32_spill] sm:$0xff]  ;;  %v3166_v51 = vld [vmem:[#allocation33_spill] sm:$0xff] }
 0x3ed   :  { %1499 = vmatpush.msra.mxu2 %v2515_v14  ;;  %1519 = vmatpush.msra.mxu3 %v2518_v15  ;;  %v3153_v14 = vld [vmem:[#allocation23_spill] sm:$0xff]  ;;  %v3154_v15 = vld [vmem:[#allocation24_spill] sm:$0xff] }
 0x3ee   :  { %1460 = vmatpush.msra.mxu0 %v2616_v2  ;;  %1480 = vmatpush.msra.mxu1 %v2619_v59  ;;  %v3167_v2 = vld [vmem:[#allocation44_spill] sm:$0xff]  ;;  %v3168_v59 = vld [vmem:[#allocation43_spill] sm:$0xff] }
 0x3ef   :  { %1500 = vmatpush.msra.mxu2 %v2523_v18  ;;  %1520 = vmatpush.msra.mxu3 %v2526_v19  ;;  %v3155_v18 = vld [vmem:[#allocation38_spill] sm:$0xff]  ;;  %v3156_v19 = vld [vmem:[#allocation35_spill] sm:$0xff] }
 0x3f0   :  { %1461 = vmatpush.msra.mxu0 %v2624_v63  ;;  %1481 = vmatpush.msra.mxu1 %v2627_v39  ;;  %v3169_v63 = vld [vmem:[#allocation36_spill] sm:$0xff]  ;;  %v3170_v39 = vld [vmem:[#allocation37_spill] sm:$0xff] }
 0x3f1   :  { %1501 = vmatpush.msra.mxu2 %v2630_v40  ;;  %1521 = vmatpush.msra.mxu3 %v2633_v56  ;;  %v3171_v40 = vld [vmem:[#allocation45_spill] sm:$0xff] }
 0x3f2   :  { %1462 = vmatpush.msra.mxu0 %v2636_v52  ;;  %1482 = vmatpush.msra.mxu1 %v2639_v49 }
 0x3f3   :  { %1502 = vmatpush.msra.mxu2 %v2642_v41  ;;  %1522 = vmatpush.msra.mxu3 %v2645_v45 }
 0x3f4   :  { %1463 = vmatpush.msra.mxu0 %v2648_v44  ;;  %1483 = vmatpush.msra.mxu1 %v2651_v3 }
 0x3f5   :  { %1503 = vmatpush.msra.mxu2 %v2654_v48  ;;  %1523 = vmatpush.msra.mxu3 %v2657_v50 }
 0x3f6   :  { %1464 = vmatpush.msra.mxu0 %v2660_v53  ;;  %1484 = vmatpush.msra.mxu1 %v3145_v58  ;;  %v1126_v53 = vld [vmem:[#allocation2 + $0x5] ss:$8 sm:$0xf] }
 0x3f7   :  { %1504 = vmatpush.msra.mxu2 %v3146_v36  ;;  %1524 = vmatpush.msra.mxu3 %v3147_v17 }
 0x3f8   :  { %1465 = vmatpush.msra.mxu0 %v3148_v47  ;;  %1485 = vmatpush.msra.mxu1 %v3149_v6 }
 0x3f9   :  { %1505 = vmatpush.msra.mxu2 %v3150_v7  ;;  %1525 = vmatpush.msra.mxu3 %v3151_v10 }
 0x3fa   :  { %1466 = vmatpush.msra.mxu0 %v3152_v11  ;;  %1486 = vmatpush.msra.mxu1 %v3153_v14 }
 0x3fb   :  { %1506 = vmatpush.msra.mxu2 %v3154_v15  ;;  %1526 = vmatpush.msra.mxu3 %v3155_v18 }
 0x3fc   :  { %1467 = vmatpush.msra.mxu0 %v3156_v19  ;;  %1487 = vmatpush.msra.mxu1 %v3157_v32 }
 0x3fd   :  { %1507 = vmatpush.msra.mxu2 %v3158_v8  ;;  %1527 = vmatpush.msra.mxu3 %v3159_v9 }
 0x3fe   :  { %1468 = vmatpush.msra.mxu0 %v3160_v12  ;;  %1488 = vmatpush.msra.mxu1 %v3161_v13 }
 0x3ff   :  { %1508 = vmatpush.msra.mxu2 %v3162_v16  ;;  %1528 = vmatpush.msra.mxu3 %v3163_v37 }
 0x400   :  { %1469 = vmatpush.msra.mxu0 %v3164_v57  ;;  %1489 = vmatpush.msra.mxu1 %v3165_v54 }
 0x401   :  { %1509 = vmatpush.msra.mxu2 %v3166_v51  ;;  %1529 = vmatpush.msra.mxu3 %v3167_v2 }
 0x402   :  { %1470 = vmatpush.msra.mxu0 %v3168_v59  ;;  %1490 = vmatpush.msra.mxu1 %v3169_v63 }
 0x403   :  { %1510 = vmatpush.msra.mxu2 %v3170_v39  ;;  %1530 = vmatpush.msra.mxu3 %v3171_v40 }
 0x45f   :  { %v1164_v56 = vpop.f32.mrf.mxu1  ;;  %v1144_v3 = vpop.f32.mrf.mxu0 }
 0x460   :  { %v1211_v52 = vrot.slane %v1164_v56, 7 }
 0x462   :  { %v1214_v48 = vsel %vm391_vm1, %v1144_v3, %v1211_v52 }
 0x466   :  { %v1184_v49 = vpop.f32.mrf.mxu2  ;;  %v1204_v41 = vpop.f32.mrf.mxu3 }
 0x467   :  { %v1212_v45 = vrot.slane %v1184_v49, 6  ;;  %v1213_v44 = vrot.slane %v1204_v41, 5 }
 0x469   :  { %v1215_v50 = vsel %vm393_vm0, %v1212_v45, %v1213_v44  ;;  %v1290_v44 = vld [vmem:[#allocation2 + $0x6] ss:$8 sm:$0xf] }
 0x46a   :  { %v1216_v55 = vsel %vm395_vm2, %v1214_v48, %v1215_v50 }
 0x46b   :  { %v1218_v42 = vadd.f32 %v1216_v55, %v1126_v53 }
 0x46d   :  { %v1669_v21 = vmul.f32 -1.442695, %v1218_v42  ;;  %v1239_v46 = vrot.slane %v1218_v42, 1  ;;  %v1263_v60 = vrot.slane %v1218_v42, 3  ;;  %v1260_v5 = vrot.slane %v1218_v42, 2 }
 0x46f   :  { %1767 = vpow2.f32 %v1669_v21  ;;  %v1670_v34 = vmul.f32 -1.442695, %v1239_v46  ;;  %v1671_v24 = vmul.f32 -1.442695, %v1263_v60 }
 0x471   :  { %1769 = vpow2.f32 %v1670_v34 }
 0x472   :  { %1771 = vpow2.f32 %v1671_v24 }
 0x475   :  { %v1768_v33 = vpop.eup %1767 }
 0x476   :  { %v1222_v0 = vadd.f32 1.0, %v1768_v33 }
 0x477   :  { %v1770_v61 = vpop.eup %1769 }
 0x478   :  { %v1772_v26 = vpop.eup %1771  ;;  %1773 = vrcp.f32 %v1222_v0  ;;  %v1244_v29 = vadd.f32 1.0, %v1770_v61  ;;  %v1234_v31 = vand.u32 2147483648, %v1222_v0  ;;  %v1232_v1 = vand.u32 2147483647, %v1222_v0 }
 0x479   :  { %v1268_v28 = vadd.f32 1.0, %v1772_v26  ;;  %vm1228_vm12 = vweird.f32 %v1222_v0 }
 0x47a   :  { %1775 = vrcp.f32 %v1244_v29  ;;  %v1256_v20 = vand.u32 2147483648, %v1244_v29  ;;  %v1254_v17 = vand.u32 2147483647, %v1244_v29  ;;  %v1235_v47 = vor.u32 1.1754944e-38, %v1234_v31 }
 0x47b   :  { %1777 = vrcp.f32 %v1268_v28  ;;  %vm1233_vm15 = vcmp.eq.f32.partialorder %v1232_v1, 8.507059e+37  ;;  %vm1250_vm3 = vweird.f32 %v1244_v29  ;;  %v1280_v16 = vand.u32 2147483648, %v1268_v28 }
 0x47c   :  { %1779 = vtanh.f32 %v1260_v5  ;;  %v1257_v14 = vor.u32 1.1754944e-38, %v1256_v20  ;;  %vm1255_vm5 = vcmp.eq.f32.partialorder %v1254_v17, 8.507059e+37  ;;  %vm1274_vm7 = vweird.f32 %v1268_v28 }
 0x47d   :  { %v1278_v37 = vand.u32 2147483647, %v1268_v28  ;;  %v1281_v54 = vor.u32 1.1754944e-38, %v1280_v16 }
 0x47e   :  { %v1774_v23 = vpop.eup %1773 }
 0x47f   :  { %v1224_v35 = vmul.f32 %v1774_v23, %v1222_v0  ;;  %vm1229_vm11 = vweird.f32 %v1774_v23  ;;  %vm1279_vm9 = vcmp.eq.f32.partialorder %v1278_v37, 8.507059e+37 }
 0x480   :  { %v1776_v22 = vpop.eup %1775  ;;  %vm1230_vm14 = vmor %vm1228_vm12, %vm1229_vm11 }
 0x481   :  { %v1778_v38 = vpop.eup %1777  ;;  %v1225_v43 = vsub.f32 1.0, %v1224_v35  ;;  %v1246_v25 = vmul.f32 %v1776_v22, %v1244_v29  ;;  %vm1251_vm13 = vweird.f32 %v1776_v22 }
 0x482   :  { %v1270_v30 = vmul.f32 %v1778_v38, %v1268_v28  ;;  %vm1252_vm4 = vmor %vm1250_vm3, %vm1251_vm13  ;;  %v1780_v18 = vpop.eup %1779  ;;  %vm1275_vm6 = vweird.f32 %v1778_v38 }
 0x483   :  { %v1226_v27 = vmul.f32 %v1774_v23, %v1225_v43  ;;  %v1247_v4 = vsub.f32 1.0, %v1246_v25  ;;  %vm1276_vm8 = vmor %vm1274_vm7, %vm1275_vm6 }
 0x484   :  { %v1271_v6 = vsub.f32 1.0, %v1270_v30 }
 0x485   :  { %v1227_v58 = vadd.f32 %v1774_v23, %v1226_v27  ;;  %v1248_v36 = vmul.f32 %v1776_v22, %v1247_v4 }
 0x486   :  { %v1272_v32 = vmul.f32 %v1778_v38, %v1271_v6 }
 0x487   :  { %v1231_v7 = vsel %vm1230_vm14, %v1774_v23, %v1227_v58  ;;  %v1249_v10 = vadd.f32 %v1776_v22, %v1248_v36 }
 0x488   :  { %v1236_v11 = vsel %vm1233_vm15, %v1235_v47, %v1231_v7  ;;  %v1273_v13 = vadd.f32 %v1778_v38, %v1272_v32 }
 0x489   :  { %v1253_v15 = vsel %vm1252_vm4, %v1776_v22, %v1249_v10  ;;  %v1285_v9 = vmul.f32 %v1780_v18, %v1236_v11 }
 0x48a   :  { %v1258_v19 = vsel %vm1255_vm5, %v1257_v14, %v1253_v15  ;;  %v1277_v57 = vsel %vm1276_vm8, %v1778_v38, %v1273_v13 }
 0x48b   :  { %v1284_v8 = vmul.f32 %v1258_v19, %v2819_v62  ;;  %v1282_v2 = vsel %vm1279_vm9, %v1281_v54, %v1277_v57 }
 0x48d   :  { %v2890_v12 = vadd.f32 %v1285_v9, %v1284_v8 }
 0x48f   :  { %1781 = vtanh.f32 %v2890_v12 }
 0x495   :  { %v1782_v51 = vpop.eup %1781 }
 0x496   :  { %v1288_v59 = vmul.f32 %v1782_v51, %v1282_v2 }
 0x498   :  { %1307 = vmatmul.f32.vlgmr.msrb.gmra.mxu0 %v1288_v59  ;;  %1327 = vmatmul.f32.vlgmr.msrb.gmra.mxu1 %v1288_v59 }
 0x499   :  { %1347 = vmatmul.f32.vlgmr.msrb.gmra.mxu2 %v1288_v59  ;;  %1367 = vmatmul.f32.vlgmr.msrb.gmra.mxu3 %v1288_v59 }
 0x515   :  { %v1328_v62 = vpop.f32.mrf.mxu1  ;;  %v1308_v49 = vpop.f32.mrf.mxu0 }
 0x516   :  { %v1375_v63 = vrot.slane %v1328_v62, 7 }
 0x518   :  { %v1378_v41 = vsel %vm391_vm1, %v1308_v49, %v1375_v63 }
 0x51c   :  { %v1348_v39 = vpop.f32.mrf.mxu2  ;;  %v1368_v40 = vpop.f32.mrf.mxu3 }
 0x51d   :  { %v1376_v56 = vrot.slane %v1348_v39, 6  ;;  %v1377_v52 = vrot.slane %v1368_v40, 5 }
 0x51f   :  { %v1379_v45 = vsel %vm393_vm0, %v1376_v56, %v1377_v52  ;;  %v1454_v52 = vld [vmem:[#allocation2 + $0x7] ss:$8 sm:$0xf] }
 0x520   :  { %v1380_v3 = vsel %vm395_vm2, %v1378_v41, %v1379_v45 }
 0x521   :  { %v1382_v48 = vadd.f32 %v1380_v3, %v1290_v44 }
 0x523   :  { %v1672_v50 = vmul.f32 -1.442695, %v1382_v48  ;;  %v1403_v53 = vrot.slane %v1382_v48, 1  ;;  %v1427_v55 = vrot.slane %v1382_v48, 3  ;;  %v1424_v28 = vrot.slane %v1382_v48, 2 }
 0x525   :  { %1783 = vpow2.f32 %v1672_v50  ;;  %v1673_v42 = vmul.f32 -1.442695, %v1403_v53  ;;  %v1674_v21 = vmul.f32 -1.442695, %v1427_v55 }
 0x527   :  { %1785 = vpow2.f32 %v1673_v42 }
 0x528   :  { %1787 = vpow2.f32 %v1674_v21 }
 0x52b   :  { %v1784_v46 = vpop.eup %1783 }
 0x52c   :  { %v1386_v60 = vadd.f32 1.0, %v1784_v46 }
 0x52d   :  { %v1786_v34 = vpop.eup %1785 }
 0x52e   :  { %v1788_v24 = vpop.eup %1787  ;;  %1789 = vrcp.f32 %v1386_v60  ;;  %v1408_v33 = vadd.f32 1.0, %v1786_v34  ;;  %v1398_v5 = vand.u32 2147483648, %v1386_v60  ;;  %v1396_v25 = vand.u32 2147483647, %v1386_v60 }
 0x52f   :  { %v1432_v0 = vadd.f32 1.0, %v1788_v24  ;;  %vm1392_vm11 = vweird.f32 %v1386_v60 }
 0x530   :  { %1791 = vrcp.f32 %v1408_v33  ;;  %v1420_v30 = vand.u32 2147483648, %v1408_v33  ;;  %v1418_v4 = vand.u32 2147483647, %v1408_v33  ;;  %v1399_v20 = vor.u32 1.1754944e-38, %v1398_v5 }
 0x531   :  { %1793 = vrcp.f32 %v1432_v0  ;;  %vm1397_vm14 = vcmp.eq.f32.partialorder %v1396_v25, 8.507059e+37  ;;  %vm1414_vm15 = vweird.f32 %v1408_v33  ;;  %v1444_v8 = vand.u32 2147483648, %v1432_v0 }
 0x532   :  { %1795 = vtanh.f32 %v1424_v28  ;;  %v1421_v6 = vor.u32 1.1754944e-38, %v1420_v30  ;;  %vm1419_vm4 = vcmp.eq.f32.partialorder %v1418_v4, 8.507059e+37  ;;  %vm1438_vm6 = vweird.f32 %v1432_v0 }
 0x533   :  { %v1442_v9 = vand.u32 2147483647, %v1432_v0  ;;  %v1445_v16 = vor.u32 1.1754944e-38, %v1444_v8 }
 0x534   :  { %v1790_v61 = vpop.eup %1789 }
 0x535   :  { %v1388_v26 = vmul.f32 %v1790_v61, %v1386_v60  ;;  %vm1393_vm10 = vweird.f32 %v1790_v61  ;;  %vm1443_vm8 = vcmp.eq.f32.partialorder %v1442_v9, 8.507059e+37 }
 0x536   :  { %v1792_v29 = vpop.eup %1791  ;;  %vm1394_vm13 = vmor %vm1392_vm11, %vm1393_vm10 }
 0x537   :  { %v1794_v23 = vpop.eup %1793  ;;  %v1389_v35 = vsub.f32 1.0, %v1388_v26  ;;  %v1410_v22 = vmul.f32 %v1792_v29, %v1408_v33  ;;  %vm1415_vm12 = vweird.f32 %v1792_v29 }
 0x538   :  { %v1434_v38 = vmul.f32 %v1794_v23, %v1432_v0  ;;  %vm1416_vm3 = vmor %vm1414_vm15, %vm1415_vm12  ;;  %v1796_v10 = vpop.eup %1795  ;;  %vm1439_vm5 = vweird.f32 %v1794_v23 }
 0x539   :  { %v1390_v43 = vmul.f32 %v1790_v61, %v1389_v35  ;;  %v1411_v31 = vsub.f32 1.0, %v1410_v22  ;;  %vm1440_vm7 = vmor %vm1438_vm6, %vm1439_vm5 }
 0x53a   :  { %v1435_v58 = vsub.f32 1.0, %v1434_v38 }
 0x53b   :  { %v1391_v27 = vadd.f32 %v1790_v61, %v1390_v43  ;;  %v1412_v1 = vmul.f32 %v1792_v29, %v1411_v31 }
 0x53c   :  { %v1436_v14 = vmul.f32 %v1794_v23, %v1435_v58 }
 0x53d   :  { %v1395_v36 = vsel %vm1394_vm13, %v1790_v61, %v1391_v27  ;;  %v1413_v17 = vadd.f32 %v1792_v29, %v1412_v1 }
 0x53e   :  { %v1400_v47 = vsel %vm1397_vm14, %v1399_v20, %v1395_v36  ;;  %v1437_v32 = vadd.f32 %v1794_v23, %v1436_v14 }
 0x53f   :  { %v1417_v7 = vsel %vm1416_vm3, %v1792_v29, %v1413_v17  ;;  %v1449_v18 = vmul.f32 %v1796_v10, %v1400_v47 }
 0x540   :  { %v1422_v11 = vsel %vm1419_vm4, %v1421_v6, %v1417_v7  ;;  %v1441_v13 = vsel %vm1440_vm7, %v1794_v23, %v1437_v32 }
 0x541   :  { %v1448_v15 = vmul.f32 %v1422_v11, %v2890_v12  ;;  %v1446_v57 = vsel %vm1443_vm8, %v1445_v16, %v1441_v13 }
 0x543   :  { %v2897_v19 = vadd.f32 %v1449_v18, %v1448_v15 }
 0x545   :  { %1797 = vtanh.f32 %v2897_v19 }
 0x54b   :  { %v1798_v37 = vpop.eup %1797 }
 0x54c   :  { %v1452_v54 = vmul.f32 %v1798_v37, %v1446_v57 }
 0x54e   :  { %1471 = vmatmul.f32.vlgmr.msra.gmra.mxu0 %v1452_v54  ;;  %1491 = vmatmul.f32.vlgmr.msra.gmra.mxu1 %v1452_v54 }
 0x54f   :  { %1511 = vmatmul.f32.vlgmr.msra.gmra.mxu2 %v1452_v54  ;;  %1531 = vmatmul.f32.vlgmr.msra.gmra.mxu3 %v1452_v54 }
 0x5cb   :  { %v1492_v12 = vpop.f32.mrf.mxu1  ;;  %v1472_v39 = vpop.f32.mrf.mxu0 }
 0x5cc   :  { %v1539_v51 = vrot.slane %v1492_v12, 7 }
 0x5ce   :  { %v1542_v40 = vsel %vm391_vm1, %v1472_v39, %v1539_v51 }
 0x5d2   :  { %v1512_v2 = vpop.f32.mrf.mxu2  ;;  %v1532_v59 = vpop.f32.mrf.mxu3 }
 0x5d3   :  { %v1540_v62 = vrot.slane %v1512_v2, 6  ;;  %v1541_v63 = vrot.slane %v1532_v59, 5 }
 0x5d5   :  { %v1543_v56 = vsel %vm393_vm0, %v1540_v62, %v1541_v63 }
 0x5d6   :  { %v1544_v49 = vsel %vm395_vm2, %v1542_v40, %v1543_v56 }
 0x5d7   :  { %v1546_v41 = vadd.f32 %v1544_v49, %v1454_v52 }
 0x5d9   :  { %v1675_v45 = vmul.f32 -1.442695, %v1546_v41  ;;  %v1567_v44 = vrot.slane %v1546_v41, 1  ;;  %v1591_v3 = vrot.slane %v1546_v41, 3  ;;  %v1588_v0 = vrot.slane %v1546_v41, 2 }
 0x5db   :  { %1799 = vpow2.f32 %v1675_v45  ;;  %v1676_v48 = vmul.f32 -1.442695, %v1567_v44  ;;  %v1677_v50 = vmul.f32 -1.442695, %v1591_v3 }
 0x5dd   :  { %1801 = vpow2.f32 %v1676_v48 }
 0x5de   :  { %1803 = vpow2.f32 %v1677_v50 }
 0x5e1   :  { %v1800_v53 = vpop.eup %1799 }
 0x5e2   :  { %v1550_v55 = vadd.f32 1.0, %v1800_v53 }
 0x5e3   :  { %v1802_v42 = vpop.eup %1801 }
 0x5e4   :  { %v1804_v21 = vpop.eup %1803  ;;  %1805 = vrcp.f32 %v1550_v55  ;;  %v1572_v46 = vadd.f32 1.0, %v1802_v42  ;;  %v1562_v28 = vand.u32 2147483648, %v1550_v55  ;;  %v1560_v22 = vand.u32 2147483647, %v1550_v55 }
 0x5e5   :  { %v1596_v60 = vadd.f32 1.0, %v1804_v21  ;;  %vm1556_vm1 = vweird.f32 %v1550_v55 }
 0x5e6   :  { %1807 = vrcp.f32 %v1572_v46  ;;  %v1584_v38 = vand.u32 2147483648, %v1572_v46  ;;  %v1582_v31 = vand.u32 2147483647, %v1572_v46  ;;  %v1563_v30 = vor.u32 1.1754944e-38, %v1562_v28 }
 0x5e7   :  { %1809 = vrcp.f32 %v1596_v60  ;;  %vm1561_vm10 = vcmp.eq.f32.partialorder %v1560_v22, 8.507059e+37  ;;  %vm1578_vm11 = vweird.f32 %v1572_v46  ;;  %v1608_v15 = vand.u32 2147483648, %v1596_v60 }
 0x5e8   :  { %1811 = vtanh.f32 %v1588_v0  ;;  %v1585_v58 = vor.u32 1.1754944e-38, %v1584_v38  ;;  %vm1583_vm13 = vcmp.eq.f32.partialorder %v1582_v31, 8.507059e+37  ;;  %vm1602_vm15 = vweird.f32 %v1596_v60 }
 0x5e9   :  { %v1606_v18 = vand.u32 2147483647, %v1596_v60  ;;  %v1609_v8 = vor.u32 1.1754944e-38, %v1608_v15 }
 0x5ea   :  { %v1806_v34 = vpop.eup %1805 }
 0x5eb   :  { %v1552_v24 = vmul.f32 %v1806_v34, %v1550_v55  ;;  %vm1557_vm0 = vweird.f32 %v1806_v34  ;;  %vm1607_vm4 = vcmp.eq.f32.partialorder %v1606_v18, 8.507059e+37 }
 0x5ec   :  { %v1808_v33 = vpop.eup %1807  ;;  %vm1558_vm9 = vmor %vm1556_vm1, %vm1557_vm0 }
 0x5ed   :  { %v1810_v61 = vpop.eup %1809  ;;  %v1553_v26 = vsub.f32 1.0, %v1552_v24  ;;  %v1574_v29 = vmul.f32 %v1808_v33, %v1572_v46  ;;  %vm1579_vm2 = vweird.f32 %v1808_v33 }
 0x5ee   :  { %v1598_v23 = vmul.f32 %v1810_v61, %v1596_v60  ;;  %vm1580_vm12 = vmor %vm1578_vm11, %vm1579_vm2  ;;  %v1812_v17 = vpop.eup %1811  ;;  %vm1603_vm14 = vweird.f32 %v1810_v61 }
 0x5ef   :  { %v1554_v35 = vmul.f32 %v1806_v34, %v1553_v26  ;;  %v1575_v5 = vsub.f32 1.0, %v1574_v29  ;;  %vm1604_vm3 = vmor %vm1602_vm15, %vm1603_vm14 }
 0x5f0   :  { %v1599_v27 = vsub.f32 1.0, %v1598_v23 }
 0x5f1   :  { %v1555_v43 = vadd.f32 %v1806_v34, %v1554_v35  ;;  %v1576_v25 = vmul.f32 %v1808_v33, %v1575_v5 }
 0x5f2   :  { %v1600_v6 = vmul.f32 %v1810_v61, %v1599_v27 }
 0x5f3   :  { %v1559_v1 = vsel %vm1558_vm9, %v1806_v34, %v1555_v43  ;;  %v1577_v4 = vadd.f32 %v1808_v33, %v1576_v25 }
 0x5f4   :  { %v1564_v20 = vsel %vm1561_vm10, %v1563_v30, %v1559_v1  ;;  %v1601_v14 = vadd.f32 %v1810_v61, %v1600_v6 }
 0x5f5   :  { %v1581_v36 = vsel %vm1580_vm12, %v1808_v33, %v1577_v4  ;;  %v1613_v10 = vmul.f32 %v1812_v17, %v1564_v20 }
 0x5f6   :  { %v1586_v47 = vsel %vm1583_vm13, %v1585_v58, %v1581_v36  ;;  %v1605_v32 = vsel %vm1604_vm3, %v1810_v61, %v1601_v14 }
 0x5f7   :  { %v1612_v7 = vmul.f32 %v1586_v47, %v2897_v19  ;;  %v1610_v9 = vsel %vm1607_vm4, %v1609_v8, %v1605_v32 }
 0x5f9   :  { %v1614_v11 = vadd.f32 %v1613_v10, %v1612_v7 }
 0x5fb   :  { %1813 = vtanh.f32 %v1614_v11  ;;  %1618 = vst [vmem:[#allocation12] sm:$0x1] %v1614_v11 }
 0x5fc   :  { %1640 = dma.vmem_to_hbm [thread:$0]  %s1636_s3, 16, %s1638_s15, [#allocation13]  }
 0x601   :  { %v1814_v19 = vpop.eup %1813 }
 0x602   :  { %v1616_v13 = vmul.f32 %v1814_v19, %v1610_v9 }
 0x604   :  { %1617 = vst [vmem:[#allocation11] sm:$0x1] %v1616_v13 }
 0x605   :  { %1629 = dma.vmem_to_hbm [thread:$0]  %s1625_s17, 16, %s1627_s19, [#allocation5]  }
 0x606   :  { %2029 = dma.done.wait [#allocation5], 16  }
 0x607   :  { %2030 = vsyncadd [#allocation5], 4294967280 }
 0x608   :  { %2031 = dma.done.wait [#allocation13], 16  }
 0x609   :  { %2032 = vsyncadd [#allocation13], 4294967280 }
 0x60a   :  { %1649 = vsyncpa [#allocation4], 1 }
 0x60b   :  { %1650 = vsyncpa [#allocation7], 1 }
 0x60c   :  { %1651 = vsyncpa [#allocation10], 1 }
 0x60d   :  { %1652 = vsyncpa [#allocation5], 1 }
 0x60e   :  { %1653 = vsyncpa [#allocation13], 1 }

</bundles_post_ra>
